<compile_context>
chip_gen: v5e
topology: v5e:2x2
jax: 0.10.0
libtpu: 0.0.40
codegen_flags: <defaults>
</compile_context>

<pallas_src>
import math
import jax
import jax.numpy as jnp
from jax.experimental import pallas as pl
from jax.experimental.pallas import tpu as pltpu


def _timestep_embedder_kernel(t_ref, freqs_ref, w1c_ref, w1s_ref, b1_ref,
                              w2_ref, b2_ref, o_ref):
    # t_ref:     (TM, 1)      f32   (row tile of timesteps)
    # freqs_ref: (1, half)    f32
    # w1c_ref:   (half, H)    bf16  (rows of W1 hit by cos(args))
    # w1s_ref:   (half, H)    bf16  (rows of W1 hit by sin(args))
    # b1_ref:    (1, H)       f32
    # w2_ref:    (H, TN)      bf16  (current column tile of W2)
    # b2_ref:    (1, TN)      f32
    # o_ref:     (TM, TN)     f32
    t = t_ref[...]                        # (TM, 1)
    freqs = freqs_ref[...]                # (1, half)
    args = t * freqs                      # (TM, half) outer product via broadcast

    cos_e = jnp.cos(args).astype(w1c_ref.dtype)
    sin_e = jnp.sin(args).astype(w1s_ref.dtype)

    # First Linear as two accumulating matmuls (no lane-axis concat), f32 acc.
    h = (jnp.dot(cos_e, w1c_ref[...], preferred_element_type=jnp.float32)
         + jnp.dot(sin_e, w1s_ref[...], preferred_element_type=jnp.float32)
         + b1_ref[...])
    h = h * jax.nn.sigmoid(h)             # SiLU in f32

    # Second Linear: only this grid step's column tile of W2.
    out = (jnp.dot(h.astype(w2_ref.dtype), w2_ref[...],
                   preferred_element_type=jnp.float32)
           + b2_ref[...])
    o_ref[...] = out.astype(o_ref.dtype)


def prepare_timestep_embedder_params(w1, b1, w2, b2,
                                     frequency_embedding_size=256):
    """One-time (init) weight prep: split W1 by cos/sin halves, cast to bf16.

    Doing the f32->bf16 convert here (not per call) is the single biggest
    end-to-end win: the kernel is HBM-weight-stream bound.
    For odd frequency_embedding_size the PyTorch module zero-pads the last
    embedding column; that column contributes nothing, so the trailing W1 row
    is simply dropped.
    """
    half = frequency_embedding_size // 2
    w1 = jnp.asarray(w1)
    return {
        "half": half,
        "hidden": int(w2.shape[1]),
        "w1c": jnp.asarray(w1[:half], jnp.bfloat16),            # (half, H)
        "w1s": jnp.asarray(w1[half:2 * half], jnp.bfloat16),     # (half, H)
        "b1": jnp.asarray(b1, jnp.float32).reshape(1, -1),       # (1, H)
        "w2": jnp.asarray(w2, jnp.bfloat16),                     # (H, H)
        "b2": jnp.asarray(b2, jnp.float32).reshape(1, -1),       # (1, H)
    }


def _pick_col_tile(hidden):
    """Largest multiple-of-128 column tile <= 768 dividing `hidden`, preferring
    >= 2 grid steps (keeps both v7x TensorCores busy; H=1536 -> 768)."""
    if hidden % 128 != 0:
        return hidden                      # full-width fallback (full extent ok)
    best_single = None
    for tn in range(768, 127, -128):
        if hidden % tn == 0:
            if hidden // tn >= 2:
                return tn
            if best_single is None:
                best_single = tn
    return best_single if best_single is not None else hidden


def timestep_embedder(t, params, max_period=10000):
    """t: (N,) -> (N, hidden) f32, using pre-converted `params`."""
    n = t.shape[0]
    half = params["half"]
    hidden = params["hidden"]

    # Frequency table (tiny glue, f32).
    freqs = jnp.exp(
        -math.log(max_period) * jnp.arange(half, dtype=jnp.float32) / half
    ).reshape(1, half)

    # Row tiling: pad N to a sublane multiple; cap the row tile at 128 so the
    # (TM, hidden) f32 intermediates stay VMEM-bounded for large batches.
    if n <= 128:
        n_pad = max(8, ((n + 7) // 8) * 8)
        tm = n_pad
    else:
        n_pad = ((n + 127) // 128) * 128
        tm = 128
    t2d = jnp.zeros((n_pad, 1), jnp.float32).at[:n, 0].set(t.astype(jnp.float32))

    tn = _pick_col_tile(hidden)
    n_row_tiles = n_pad // tm
    n_col_tiles = hidden // tn
    grid = (n_row_tiles, n_col_tiles)

    w1c, w1s, b1_2d, w2b, b2_2d = (params["w1c"], params["w1s"], params["b1"],
                                   params["w2"], params["b2"])

    cost = pl.CostEstimate(
        # First layer is recomputed once per column tile (free filler at small N).
        flops=(n_col_tiles * 2 * n_pad * (2 * half) * hidden
               + 2 * n_pad * hidden * hidden),
        transcendentals=n_col_tiles * n_pad * (2 * half + hidden),
        bytes_accessed=((w1c.size + w1s.size + w2b.size) * 2       # bf16 weights
                        + (b1_2d.size + b2_2d.size) * 4
                        + n_pad * 4                                 # t
                        + n_pad * hidden * 4),                      # output
    )

    out = pl.pallas_call(
        _timestep_embedder_kernel,
        out_shape=jax.ShapeDtypeStruct((n_pad, hidden), jnp.float32),
        grid=grid,
        in_specs=[
            pl.BlockSpec((tm, 1), lambda i, j: (i, 0)),        # t row tile
            pl.BlockSpec((1, half), lambda i, j: (0, 0)),      # freqs (resident)
            pl.BlockSpec((half, hidden), lambda i, j: (0, 0)),  # W1 cos half
            pl.BlockSpec((half, hidden), lambda i, j: (0, 0)),  # W1 sin half
            pl.BlockSpec((1, hidden), lambda i, j: (0, 0)),     # b1
            pl.BlockSpec((hidden, tn), lambda i, j: (0, j)),    # W2 column tile
            pl.BlockSpec((1, tn), lambda i, j: (0, j)),         # b2 column tile
        ],
        out_specs=pl.BlockSpec((tm, tn), lambda i, j: (i, j)),
        compiler_params=pltpu.CompilerParams(
            dimension_semantics=("parallel", "parallel"),       # megacore-friendly
            vmem_limit_bytes=32 * 1024 * 1024,                  # fits v5e/v6e/v7x
        ),
        cost_estimate=cost,
    )(t2d, freqs, w1c, w1s, b1_2d, w2b, b2_2d)
    return out[:n]


def reference_bf16(t, w1, b1, w2, b2, frequency_embedding_size=256,
                   max_period=10000):
    """Same math as the kernel (bf16 weights/activations into f32-accum matmuls)."""
    half = frequency_embedding_size // 2
    freqs = jnp.exp(-math.log(max_period)
                    * jnp.arange(half, dtype=jnp.float32) / half)
    args = t[:, None].astype(jnp.float32) * freqs[None]
    emb = jnp.concatenate([jnp.cos(args), jnp.sin(args)], axis=-1)
    h = jnp.dot(emb.astype(jnp.bfloat16), w1.astype(jnp.bfloat16),
                preferred_element_type=jnp.float32) + b1
    h = h * jax.nn.sigmoid(h)
    return jnp.dot(h.astype(jnp.bfloat16), w2.astype(jnp.bfloat16),
                   preferred_element_type=jnp.float32) + b2


if __name__ == "__main__":
    # Small, tile-friendly stand-in shapes (real model: hidden_size=1536 -> TN=768).
    N = 8
    FREQ = 256
    HIDDEN = 512   # _pick_col_tile -> 256, i.e. 2 column grid steps

    key = jax.random.PRNGKey(0)
    k_t, k_w1, k_b1, k_w2, k_b2 = jax.random.split(key, 5)

    t = jax.random.uniform(k_t, (N,), dtype=jnp.float32) * 1000.0
    w1 = jax.random.normal(k_w1, (FREQ, HIDDEN), dtype=jnp.float32) * 0.02
    b1 = jax.random.normal(k_b1, (HIDDEN,), dtype=jnp.float32) * 0.02
    w2 = jax.random.normal(k_w2, (HIDDEN, HIDDEN), dtype=jnp.float32) * 0.02
    b2 = jax.random.normal(k_b2, (HIDDEN,), dtype=jnp.float32) * 0.02

    # Init-time weight prep (bf16 split) -- done ONCE, reused every call.
    params = prepare_timestep_embedder_params(
        w1, b1, w2, b2, frequency_embedding_size=FREQ)

    out = timestep_embedder(t, params)
    out = jax.block_until_ready(out)

    ref = reference_bf16(t, w1, b1, w2, b2, frequency_embedding_size=FREQ)
    assert out.shape == (N, HIDDEN)
    assert jnp.allclose(out, ref, atol=5e-3, rtol=5e-3), "mismatch vs reference"

    print("KERNEL_OK")
</pallas_src>

<mosaic_0001>
module attributes {stable_mosaic.version = 11 : i64} {
  func.func @_timestep_embedder_kernel(%arg0: i32, %arg1: i32, %arg2: memref<8x1xf32, #tpu.memory_space<vmem>>, %arg3: memref<1x128xf32, #tpu.memory_space<vmem>>, %arg4: memref<128x512xbf16, #tpu.memory_space<vmem>>, %arg5: memref<128x512xbf16, #tpu.memory_space<vmem>>, %arg6: memref<1x512xf32, #tpu.memory_space<vmem>>, %arg7: memref<512x256xbf16, #tpu.memory_space<vmem>>, %arg8: memref<1x256xf32, #tpu.memory_space<vmem>>, %arg9: memref<8x256xf32, #tpu.memory_space<vmem>>) attributes {dimension_semantics = [#tpu.dimension_semantics<parallel>, #tpu.dimension_semantics<parallel>], iteration_bounds = array<i64: 1, 2>, scalar_prefetch = 0 : i64, scratch_operands = 0 : i64, tpu.core_type = #tpu.core_type<tc>, window_params = [{transform_indices = @transform_0, window_bounds = array<i64: 8, 1>}, {pipeline_mode = #tpu.pipeline_mode<synchronous>, transform_indices = @transform_1, window_bounds = array<i64: 1, 128>}, {pipeline_mode = #tpu.pipeline_mode<synchronous>, transform_indices = @transform_2, window_bounds = array<i64: 128, 512>}, {pipeline_mode = #tpu.pipeline_mode<synchronous>, transform_indices = @transform_3, window_bounds = array<i64: 128, 512>}, {pipeline_mode = #tpu.pipeline_mode<synchronous>, transform_indices = @transform_4, window_bounds = array<i64: 1, 512>}, {transform_indices = @transform_5, window_bounds = array<i64: 512, 256>}, {transform_indices = @transform_6, window_bounds = array<i64: 1, 256>}, {transform_indices = @transform_7, window_bounds = array<i64: 8, 256>}]} {
    %c0 = arith.constant 0 : index
    %c0_0 = arith.constant 0 : index
    %0 = vector.load %arg2[%c0, %c0_0] : memref<8x1xf32, #tpu.memory_space<vmem>>, vector<8x1xf32>
    %c0_1 = arith.constant 0 : index
    %c0_2 = arith.constant 0 : index
    %1 = vector.load %arg3[%c0_1, %c0_2] : memref<1x128xf32, #tpu.memory_space<vmem>>, vector<1x128xf32>
    %2 = vector.broadcast %0 : vector<8x1xf32> to vector<8x128xf32>
    %3 = vector.broadcast %1 : vector<1x128xf32> to vector<8x128xf32>
    %4 = arith.mulf %2, %3 : vector<8x128xf32>
    %5 = math.cos %4 : vector<8x128xf32>
    %6 = arith.truncf %5 : vector<8x128xf32> to vector<8x128xbf16>
    %7 = math.sin %4 : vector<8x128xf32>
    %8 = arith.truncf %7 : vector<8x128xf32> to vector<8x128xbf16>
    %c0_3 = arith.constant 0 : index
    %c0_4 = arith.constant 0 : index
    %9 = vector.load %arg4[%c0_3, %c0_4] : memref<128x512xbf16, #tpu.memory_space<vmem>>, vector<128x512xbf16>
    %cst = arith.constant dense<0.000000e+00> : vector<8x512xf32>
    %10 = tpu.matmul %6, %9, %cst {dimension_numbers = #tpu.dot_dimension_numbers<[1], [0], [0], [1], [0, 0, 1, 1], [], []>} : vector<8x128xbf16>, vector<128x512xbf16>, vector<8x512xf32> -> vector<8x512xf32>
    %c0_5 = arith.constant 0 : index
    %c0_6 = arith.constant 0 : index
    %11 = vector.load %arg5[%c0_5, %c0_6] : memref<128x512xbf16, #tpu.memory_space<vmem>>, vector<128x512xbf16>
    %cst_7 = arith.constant dense<0.000000e+00> : vector<8x512xf32>
    %12 = tpu.matmul %8, %11, %cst_7 {dimension_numbers = #tpu.dot_dimension_numbers<[1], [0], [0], [1], [0, 0, 1, 1], [], []>} : vector<8x128xbf16>, vector<128x512xbf16>, vector<8x512xf32> -> vector<8x512xf32>
    %13 = arith.addf %10, %12 : vector<8x512xf32>
    %c0_8 = arith.constant 0 : index
    %c0_9 = arith.constant 0 : index
    %14 = vector.load %arg6[%c0_8, %c0_9] : memref<1x512xf32, #tpu.memory_space<vmem>>, vector<1x512xf32>
    %15 = vector.broadcast %14 : vector<1x512xf32> to vector<8x512xf32>
    %16 = arith.addf %13, %15 : vector<8x512xf32>
    %17 = arith.negf %16 : vector<8x512xf32>
    %18 = math.exp %17 : vector<8x512xf32>
    %cst_10 = arith.constant 1.000000e+00 : f32
    %19 = vector.broadcast %cst_10 : f32 to vector<8x512xf32>
    %20 = arith.addf %19, %18 : vector<8x512xf32>
    %21 = arith.divf %19, %20 : vector<8x512xf32>
    %22 = arith.mulf %16, %21 : vector<8x512xf32>
    %23 = arith.truncf %22 : vector<8x512xf32> to vector<8x512xbf16>
    %c0_11 = arith.constant 0 : index
    %c0_12 = arith.constant 0 : index
    %24 = vector.load %arg7[%c0_11, %c0_12] : memref<512x256xbf16, #tpu.memory_space<vmem>>, vector<512x256xbf16>
    %cst_13 = arith.constant dense<0.000000e+00> : vector<8x256xf32>
    %25 = tpu.matmul %23, %24, %cst_13 {dimension_numbers = #tpu.dot_dimension_numbers<[1], [0], [0], [1], [0, 0, 1, 1], [], []>} : vector<8x512xbf16>, vector<512x256xbf16>, vector<8x256xf32> -> vector<8x256xf32>
    %c0_14 = arith.constant 0 : index
    %c0_15 = arith.constant 0 : index
    %26 = vector.load %arg8[%c0_14, %c0_15] : memref<1x256xf32, #tpu.memory_space<vmem>>, vector<1x256xf32>
    %27 = vector.broadcast %26 : vector<1x256xf32> to vector<8x256xf32>
    %28 = arith.addf %25, %27 : vector<8x256xf32>
    %c0_16 = arith.constant 0 : index
    %c0_17 = arith.constant 0 : index
    %29 = vector.load %arg9[%c0_16, %c0_17] : memref<8x256xf32, #tpu.memory_space<vmem>>, vector<8x256xf32>
    tpu.vector_store %arg9[%c0_16, %c0_17], %28 {strides = array<i32>} : memref<8x256xf32, #tpu.memory_space<vmem>>, vector<8x256xf32>,
    return
  }
  func.func @transform_0(%arg0: i32, %arg1: i32) -> (i32, i32) {
    %c0_i32 = arith.constant 0 : i32
    %c0_i32_0 = arith.constant 0 : i32
    return %arg0, %c0_i32 : i32, i32
  }
  func.func @transform_1(%arg0: i32, %arg1: i32) -> (i32, i32) {
    %c0_i32 = arith.constant 0 : i32
    %c0_i32_0 = arith.constant 0 : i32
    %c0_i32_1 = arith.constant 0 : i32
    return %c0_i32, %c0_i32_0 : i32, i32
  }
  func.func @transform_2(%arg0: i32, %arg1: i32) -> (i32, i32) {
    %c0_i32 = arith.constant 0 : i32
    %c0_i32_0 = arith.constant 0 : i32
    %c0_i32_1 = arith.constant 0 : i32
    return %c0_i32, %c0_i32_0 : i32, i32
  }
  func.func @transform_3(%arg0: i32, %arg1: i32) -> (i32, i32) {
    %c0_i32 = arith.constant 0 : i32
    %c0_i32_0 = arith.constant 0 : i32
    %c0_i32_1 = arith.constant 0 : i32
    return %c0_i32, %c0_i32_0 : i32, i32
  }
  func.func @transform_4(%arg0: i32, %arg1: i32) -> (i32, i32) {
    %c0_i32 = arith.constant 0 : i32
    %c0_i32_0 = arith.constant 0 : i32
    %c0_i32_1 = arith.constant 0 : i32
    return %c0_i32, %c0_i32_0 : i32, i32
  }
  func.func @transform_5(%arg0: i32, %arg1: i32) -> (i32, i32) {
    %c0_i32 = arith.constant 0 : i32
    %c0_i32_0 = arith.constant 0 : i32
    return %c0_i32, %arg1 : i32, i32
  }
  func.func @transform_6(%arg0: i32, %arg1: i32) -> (i32, i32) {
    %c0_i32 = arith.constant 0 : i32
    %c0_i32_0 = arith.constant 0 : i32
    return %c0_i32, %arg1 : i32, i32
  }
  func.func @transform_7(%arg0: i32, %arg1: i32) -> (i32, i32) {
    %c0_i32 = arith.constant 0 : i32
    return %arg0, %arg1 : i32, i32
  }
}

</mosaic_0001>

<bundles_post_ra>
// kernel: tpu_custom_call.1
= control target key start
LH: loop header
LB: loop body
LE: loop exit
PB: predicated region body
PF: predicated region fallthrough
CT: control target
= control target key end

     0   :  { %s3482_s0 = inlined_call_operand.vmem [shape: f32[8,1], index: 0, kind: input, shape index: {}]   ;;  %s3483_s1 = inlined_call_operand.vmem [shape: f32[1,128], index: 1, kind: input, shape index: {}]   ;;  %s3484_s2 = inlined_call_operand.hbm [shape: bf16[128,512], index: 2, kind: input, shape index: {}]   ;;  %s3485_s3 = inlined_call_operand.hbm [shape: bf16[128,512], index: 3, kind: input, shape index: {}]   ;;  %s3486_s4 = inlined_call_operand.vmem [shape: f32[1,512], index: 4, kind: input, shape index: {}]   ;;  %s3487_s5 = inlined_call_operand.hbm [shape: bf16[512,512], index: 5, kind: input, shape index: {}]   ;;  %s3488_s6 = inlined_call_operand.vmem [shape: f32[1,512], index: 6, kind: input, shape index: {}]   ;;  %s3489_s7 = inlined_call_operand.hbm [shape: f32[8,512], index: 7, kind: output, shape index: {}]  }
   0x1   :  { %3498 = sst [smem:[#allocation17_spill]] %s3484_s2 }
   0x2   :  { %3499 = sst [smem:[#allocation18_spill]] %s3485_s3 }
   0x3   :  { %3500 = sst [smem:[#allocation19_spill]] %s3489_s7 }
   0x4   :  { %12 = vsyncpa [#allocation3], 0 }
   0x5   :  { %13 = vsyncpa [#allocation6], 0 }
   0x6   :  { %14 = vsyncpa [#allocation4], 0 }
   0x7   :  { %16 = vsyncpa [#allocation4 + $0x1], 0  ;;  %s2949_s24 = smov 0   ;;  %s2951_s25 = smov 0  }
   0x8   :  { %s2953_s26 = smov 0   ;;  %s2955_s27 = smov 0  }
   0x9   :  { %s2957_s28 = smov 0   ;;  %s2959_s29 = smov 0  }
   0xa LB: > { %3501 = sst [smem:[#allocation13_spill]] %s2874_s24  ;;  %s2980_s30 = sadd.s32 4294967295, %s2894_s29   ;;  %s2894_s29 = sphi %s2959_s29, %s22_s29   ;;  %s2890_s28 = sphi %s2957_s28, %s3531_s28   ;;  %s2886_s27 = sphi %s2955_s27, %s3530_s27   ;;  %s2882_s26 = sphi %s2953_s26, %s3529_s26   ;;  %s2878_s25 = sphi %s2951_s25, %s3528_s25   ;;  %s2874_s24 = sphi %s2949_s24, %s3527_s24  }
   0xb   : > { %3502 = sst [smem:[#allocation14_spill]] %s2894_s29  ;;  %s1930_s8 = sadd.s32 4294967294, %s2894_s29  }
   0xc   : > { %p158_p0 = scmp.ne.s32.totalorder %s2882_s26, %s2878_s25  ;;  %p159_p1 = scmp.eq.s32.totalorder %s2894_s29, 0 }
   0xd   : > { %p164_p2 = scmp.ne.s32.totalorder %s2878_s25, %s2874_s24  ;;  %p165_p3 = scmp.eq.s32.totalorder %s2980_s30, 0 }
   0xe   : > { %p2989_p4 = por %p159_p1, %p158_p0  ;;  %p216_p5 = scmp.eq.s32.totalorder %s2980_s30, 1 }
   0xf   : > { %p2996_p6 = por %p165_p3, %p164_p2  ;;  %p222_p7 = scmp.eq.s32.totalorder %s1930_s8, 1 }
  0x10   : > { %p3000_p8 = por %p216_p5, %p158_p0  ;;  %p1931_p9 = scmp.ge.s32.totalorder %s2894_s29, 1 }
  0x11   : > { %p3005_p10 = por %p222_p7, %p164_p2  ;;  %p229_p11 = scmp.lt.s32.totalorder %s2894_s29, 3 }
  0x12   : > { %s3505_s11 = scalar_select %p3000_p8, 1, 0 }
  0x13   : > { %s3507_s12 = scalar_select %p3005_p10, 1, 0 }
  0x14   : > { %3506 = sst [smem:[#allocation15_spill]] %s3505_s11  ;;  %p3013_p12 = pnand %p1931_p9, %p229_p11 }
  0x15   : > { %3508 = sst [smem:[#allocation16_spill]] %s3507_s12  ;;  %s2896_s17 = smov [#allocation2]  }
  0x16   : > { %s3509_s2 = sld [smem:[#allocation17_spill]]  ;;  %p2614_p13 = pneg %p3013_p12 }
  0x17   : > { %s252_s18 = sshll.u32 %s2896_s17, 4  ;;  %p1935_p1 = scmp.ge.s32.totalorder %s2894_s29, 2  ;;  %s253_s18 = int_to_ptr.vmem [resolvable:$true] %s252_s18 }
  0x18   : > { %p2615_p0 = pnand %p2614_p13, %p165_p3  ;;  %p2631_p2 = scmp.lt.s32.totalorder %s2894_s29, 2 }
  0x19   : > { %s3511_s3 = sld [smem:[#allocation18_spill]]  ;;  %s3492_s22 = smov 256  }
  0x1a   : > { %s2898_s23 = smov 16   ;;  %p3030_p5 = pnand %p2631_p2, %p2989_p4 }
  0x1b   : > { %s2899_s13 = smov [#allocation5]   ;;  %s151_s17 = sadd.s32 1, %s2882_s26 }
  0x1c   : > { %s250_s15 = sshll.u32 %s3509_s2, 4  ;;  %s266_s14 = sshll.u32 %s2899_s13, 4  ;;  %s251_s15 = int_to_ptr.hbm [resolvable:$true] %s250_s15  ;;  %s267_s14 = int_to_ptr.vmem [resolvable:$true] %s266_s14 }
  0x1d   : > { %2617 = dma.hbm_to_vmem [thread:$0]  (!%p2615_p0), %s251_s15, 4096, %s253_s18, [#allocation3], %s3492_s22, %s3492_s22, %s2898_s23  }
  0x1e   : > { %s31_s19 = sadd.s32 1, %s2890_s28  ;;  %s283_s20 = sand.u32 1, %s2894_s29  }
  0x1f   : > { %s264_s21 = sshll.u32 %s3511_s3, 4  ;;  %p32_p7 = scmp.ge.s32.totalorder %s31_s19, 2  ;;  %s265_s21 = int_to_ptr.hbm [resolvable:$true] %s264_s21 }
  0x20   : > { %2620 = dma.hbm_to_vmem [thread:$0]  (!%p2615_p0), %s265_s21, 4096, %s267_s14, [#allocation6], %s3492_s22, %s3492_s22, %s2898_s23  }
  0x21   : > { %s285_s2 = sand.u32 1, %s2882_s26   ;;  %s2472_s3 = sshll.u32 %s2890_s28, 3 }
  0x22   : > { %s3533_s19 = smov (%p32_p7, %s31_s19), 0  ;;  %s1936_s9 = sshll.u32 %s285_s2, 9 }
  0x23   : > { %s292_s13 = scalar_lea.hbm %s3487_s5, %s2472_s3  ;;  %s148_s12 = ssub.s32 %s2890_s28, %s3533_s19 }
  0x24   : > { %p149_p4 = scmp.eq.s32.totalorder %s148_s12, 0  ;;  %s293_s24 = sshll.u32 %s292_s13, 4  ;;  %s294_s24 = int_to_ptr.hbm [resolvable:$true] %s293_s24 }
  0x25   : > { %s287_s21 = scalar_lea.vmem [#allocation7], %s1936_s9  ;;  %s284_s22 = scalar_lea.sflag [#allocation3], %s283_s20 }
  0x26   : > { %s295_s23 = sshll.u32 %s287_s21, 4  ;;  %s2900_s29 = smov 128   ;;  %s296_s23 = int_to_ptr.vmem [resolvable:$true] %s295_s23 }
  0x27   : > { %s3049_s14 = scalar_select %p149_p4, %s2882_s26, %s151_s17  }
  0x28   : > { %s2901_s11 = smov 8   ;;  %s3513_s7 = smov 256  }
  0x29   : > { %2624 = dma.hbm_to_vmem [thread:$0]  (!%p3030_p5), %s294_s24, 8192, %s296_s23, %s284_s22, %s3513_s7, %s2900_s29, %s2901_s11  }
  0x2a   : > { %315 = sbr.rel (%p3013_p12) target bundleno = 613 (0x265), region = 48 }
  0x2f   : > { %2857 = dma.done.wait (%p165_p3), [#allocation3], 4096  }
  0x30   : > { %2859 = vsyncadd (%p165_p3), [#allocation3], 4294963200 }
  0x31   : > { %2861 = dma.done.wait (%p165_p3), [#allocation6], 4096  }
  0x32   : > { %2863 = vsyncadd (%p165_p3), [#allocation6], 4294963200  ;;  %s327_s2 = sand.u32 1, %s2980_s30   ;;  %s3066_s3 = sand.u32 1, %s2878_s25  }
  0x33   : > { %s1942_s7 = sshll.u32 %s3066_s3, 9  ;;  %s328_s24 = scalar_lea.sflag [#allocation3], %s327_s2 }
  0x34   : > { %s3069_s29 = scalar_lea.vmem [#allocation7], %s1942_s7 }
  0x35   : > { %2865 = dma.done.wait (%p2996_p6), %s328_s24, 8192  }
  0x36   : > { %2867 = vsyncadd (%p2996_p6), %s328_s24, 4294959104  ;;  %v2902_v0 = vmov 0   ;;  %v382_v1 = vld [vmem:[%s3482_s0] sm:$0xff]  ;;  %v2903_v16 = vmov 683565275   ;;  %s1944_s8 = sshll.u32 %s2886_s27, 1 }
  0x37   : > { %2696 = vset.pattern.permute.xlu0 %v2902_v0  ;;  %v2697_v2 = vld [vmem:[%s3483_s1] ss:$0 sm:$0xff]  ;;  %v2904_v18 = vmov 2475754826   ;;  %v2905_v21 = vmov 2131351028  }
  0x38   : > { %386 = vperm.xlu0 %2696, %v382_v1   ;;  %v2906_v24 = vmov 2102212464   ;;  %v2907_v27 = vmov 920167782   ;;  %v2908_v30 = vmov 1326507024  }
  0x39   : > { %v2065_v54 = vld [vmem:[#allocation5 + $0xe0] sm:$0xf]  ;;  %v2535_v58 = vld [vmem:[#allocation5 + $0xec] sm:$0xf0]  ;;  %v2533_v59 = vld [vmem:[#allocation5 + $0xe4] sm:$0xf] }
  0x3a   : > { %v2067_v60 = vld [vmem:[#allocation5 + $0xf0] sm:$0xf0]  ;;  %p377_p3 = scmp.lt.s32.totalorder %s1944_s8, 3  ;;  %s1943_s15 = sshll.u32 %s3066_s3, 4 }
  0x3b   : > { %s370_s18 = scalar_lea.vmem [#allocation8], %s1943_s15  ;;  %s2601_s13 = sshll.u32 %s2886_s27, 4 }
  0x3c   : > { %s3535_s8 = smov (!%p377_p3, %s1944_s8), 3  ;;  %s3522_s2 = sld [smem:[#allocation19_spill]] }
  0x3d   : > { %s379_s9 = scalar_lea.vmem %s3488_s6, %s3535_s8  ;;  %s1787_s12 = scalar_lea.sflag [#allocation4], %s3066_s3 }
  0x42   : > { %s1800_s7 = scalar_lea.hbm %s3522_s2, %s2601_s13  ;;  %s2824_s22 = scalar_lea.hbm %s3522_s2, 32 }
  0x43   : > { %s1804_s11 = sshll.u32 %s1800_s7, 4  ;;  %s1805_s11 = int_to_ptr.hbm [resolvable:$true] %s1804_s11 }
  0x44   : > { %s2818_s27 = sshra.s32 %s1805_s11, 4  ;;  %s2819_s27 = int_to_ptr.hbm [resolvable:$true] %s2818_s27 }
  0x45   : > { %s2820_s30 = scalar_lea.hbm %s2819_s27, 16  ;;  %p2825_p12 = scmp.lt.s32.totalorder %s2819_s27, %s3522_s2 }
  0x46   : > { %p2821_p6 = scmp.ne.s32.totalorder %s2819_s27, %s2820_s30  ;;  %p2826_p13 = scmp.lt.s32.totalorder %s2824_s22, %s2820_s30 }
  0x48   : > { %p2822_p9 = pnand %p2821_p6, %p3000_p8  ;;  %p2827_p0 = por %p2826_p13, %p2825_p12 }
  0x4a   : > { %p2823_p11 = pneg %p2822_p9 }
  0x4c   : > { %p2828_p2 = pnand %p2827_p0, %p2823_p11 }
  0xaa   : > { %v387_v3 = vpop.permute.xlu0 %386 }
  0xab   : > { %v3082_v4 = vmul.f32 %v2697_v2, %v387_v3  ;;  %v2073_v2 = vld [vmem:[#allocation5 + $0xe8] sm:$0xf]  ;;  %v2536_v3 = vld [vmem:[#allocation5 + $0xf4] sm:$0xf0] }
  0xad   : > { %v396_v5 = vand.u32 2139095040, %v3082_v4  ;;  %v393_v7 = vand.u32 2147483647, %v3082_v4  ;;  %vm395_vm12 = vcmp.lt.s32.totalorder %v3082_v4, 0 }
  0xaf   : > { %v397_v6 = vshrl.u32 %v396_v5, 23  ;;  %v400_v10 = vand.u32 8388607, %v393_v7  ;;  %v2534_v5 = vld [vmem:[#allocation5 + $0xec] sm:$0xf] }
  0xb0   : > { %vm3176_vm13 = vcmp.le.f32.partialorder %v393_v7, 0.7853982 }
  0xb1   : > { %v1945_v8 = vadd.s32 4294967169, %v397_v6  ;;  %v401_v13 = vor.u32 8388608, %v400_v10 }
  0xb3   : > { %v403_v9 = vadd.s32 1, %v1945_v8  ;;  %v3092_v35 = vshll.u32 %v401_v13, 8 }
  0xb5   : > { %vm404_vm0 = vcmp.gt.s32.totalorder %v403_v9, 0  ;;  %v442_v44 = vand.u32 65535, %v3092_v35  ;;  %v443_v48 = vshrl.u32 %v3092_v35, 16 }
  0xb6   : > { %v405_v11 = vsel %vm404_vm0, %v403_v9, 0 }
  0xb7   : > { %v407_v12 = vand.u32 31, %v405_v11  ;;  %v3088_v15 = vshrl.u32 %v405_v11, 5  ;;  %v2075_v11 = vld [vmem:[#allocation5 + $0xf8] sm:$0xf0] }
  0xb9   : > { %v408_v14 = vsub.s32 32, %v407_v12  ;;  %v410_v17 = vshll.u32 %v2903_v16, %v407_v12  ;;  %v413_v19 = vshll.u32 %v2904_v18, %v407_v12  ;;  %v416_v23 = vshll.u32 %v2905_v21, %v407_v12 }
  0xba   : > { %v419_v26 = vshll.u32 %v2906_v24, %v407_v12  ;;  %v422_v29 = vshll.u32 %v2907_v27, %v407_v12  ;;  %vm425_vm1 = vcmp.lt.s32.totalorder %v3088_v15, 1  ;;  %vm428_vm2 = vcmp.lt.s32.totalorder %v3088_v15, 4 }
  0xbb   : > { %v411_v20 = vshrl.u32 %v2904_v18, %v408_v14  ;;  %v414_v22 = vshrl.u32 %v2905_v21, %v408_v14  ;;  %v417_v25 = vshrl.u32 %v2906_v24, %v408_v14  ;;  %v420_v28 = vshrl.u32 %v2907_v27, %v408_v14  ;;  %v2531_v18 = vld [vmem:[#allocation5 + $0xcc] sm:$0xf0]  ;;  %v2057_v24 = vld [vmem:[#allocation5 + $0xc8] sm:$0xf] }
  0xbc   : > { %v423_v31 = vshrl.u32 %v2908_v30, %v408_v14  ;;  %vm427_vm3 = vcmp.lt.s32.totalorder %v3088_v15, 3  ;;  %vm426_vm4 = vcmp.lt.s32.totalorder %v3088_v15, 2  ;;  %v409_v45 = vshrl.u32 %v2903_v16, %v408_v14 }
  0xbd   : > { %v412_v32 = vor.u32 %v411_v20, %v410_v17  ;;  %v3090_v33 = vor.u32 %v414_v22, %v413_v19  ;;  %v418_v34 = vor.u32 %v417_v25, %v416_v23  ;;  %v421_v36 = vor.u32 %v420_v28, %v419_v26  ;;  %v2049_v17 = vld [vmem:[#allocation5 + $0xc0] sm:$0xf]  ;;  %v2529_v22 = vld [vmem:[#allocation5 + $0xc4] sm:$0xf]  ;;  %v2051_v23 = vld [vmem:[#allocation5 + $0xd0] sm:$0xf0] }
  0xbe   : > { %v424_v37 = vor.u32 %v423_v31, %v422_v29  ;;  %v2066_v20 = vor.u32 %v2535_v58, %v2065_v54  ;;  %v2070_v21 = vor.u32 %v2533_v59, %v2067_v60  ;;  %v2074_v27 = vor.u32 %v2536_v3, %v2073_v2  ;;  %v2532_v28 = vld [vmem:[#allocation5 + $0xd4] sm:$0xf0]  ;;  %v2530_v29 = vld [vmem:[#allocation5 + $0xcc] sm:$0xf]  ;;  %v2523_v2 = vld [vmem:[#allocation5 + $0x8c] sm:$0xf0] }
  0xbf   : > { %v433_v38 = vsel %vm425_vm1, %v412_v32, %v3090_v33  ;;  %v437_v39 = vsel %vm425_vm1, %v3090_v33, %v418_v34  ;;  %v434_v40 = vsel %vm428_vm2, %v421_v36, 920167782  ;;  %v430_v53 = vsel %vm428_vm2, %v418_v34, 2102212464  ;;  %v2526_v54 = vld [vmem:[#allocation5 + $0xac] sm:$0xf] }
  0xc0   : > { %v438_v41 = vsel %vm428_vm2, %v424_v37, 1326507024  ;;  %v435_v42 = vsel %vm427_vm3, %v418_v34, %v434_v40  ;;  %v3122_v55 = vsel %vm425_vm1, %v409_v45, %v412_v32  ;;  %928 = vmatpush.bf16.msra.mxu0 %v2066_v20  ;;  %941 = vmatpush.bf16.msra.mxu1 %v2070_v21  ;;  %v2078_v32 = vor.u32 %v2534_v5, %v2075_v11  ;;  %v2059_v34 = vld [vmem:[#allocation5 + $0xd8] sm:$0xf0]  ;;  %v2527_v40 = vld [vmem:[#allocation5 + $0xac] sm:$0xf0] }
  0xc1   : > { %v439_v43 = vsel %vm427_vm3, %v421_v36, %v438_v41  ;;  %v436_v46 = vsel %vm426_vm4, %v433_v38, %v435_v42  ;;  %v2033_v36 = vld [vmem:[#allocation5 + $0xa0] sm:$0xf]  ;;  %954 = vmatpush.bf16.msra.mxu2 %v2074_v27  ;;  %v2525_v41 = vld [vmem:[#allocation5 + $0xa4] sm:$0xf]  ;;  %v2054_v45 = vor.u32 %v2529_v22, %v2051_v23  ;;  %v2003_v20 = vld [vmem:[#allocation5 + $0x70] sm:$0xf0]  ;;  %vm536_vm1 = vweird.f32 %v3082_v4 }
  0xc2   : > { %v440_v47 = vsel %vm426_vm4, %v437_v39, %v439_v43  ;;  %v466_v51 = vand.u32 65535, %v436_v46  ;;  %v467_v52 = vshrl.u32 %v436_v46, 16  ;;  %967 = vmatpush.bf16.msra.mxu3 %v2078_v32  ;;  %v2035_v46 = vld [vmem:[#allocation5 + $0xb0] sm:$0xf0]  ;;  %v2521_v3 = vld [vmem:[#allocation5 + $0x84] sm:$0xf] }
  0xc3   : > { %v444_v49 = vand.u32 65535, %v440_v47  ;;  %v445_v50 = vshrl.u32 %v440_v47, 16  ;;  %v2041_v47 = vld [vmem:[#allocation5 + $0xa8] sm:$0xf]  ;;  %v2038_v60 = vor.u32 %v2525_v41, %v2035_v46  ;;  %v2520_v22 = vld [vmem:[#allocation5 + $0x74] sm:$0xf0] }
  0xc4   : > { %v3128_v63 = vmul.u32 %v467_v52, %v442_v44  ;;  %v3130_v1 = vmul.u32 %v466_v51, %v443_v48  ;;  %v468_v12 = vmul.u32 %v466_v51, %v442_v44  ;;  %v471_v13 = vmul.u32 %v467_v52, %v443_v48  ;;  %v2528_v52 = vld [vmem:[#allocation5 + $0xb4] sm:$0xf0]  ;;  %942 = vmatpush.bf16.msra.mxu1 %v2054_v45  ;;  %v2009_v21 = vld [vmem:[#allocation5 + $0x68] sm:$0xf]  ;;  %v1987_v32 = vld [vmem:[#allocation5 + $0x50] sm:$0xf0] }
  0xc5   : > { %v3124_v56 = vmul.u32 %v445_v50, %v442_v44  ;;  %v3126_v57 = vmul.u32 %v444_v49, %v443_v48  ;;  %v446_v61 = vmul.u32 %v444_v49, %v442_v44  ;;  %v449_v62 = vmul.u32 %v445_v50, %v443_v48  ;;  %v2511_v46 = vld [vmem:[#allocation5 + $0x2c] sm:$0xf0] }
  0xc6   : > { %v472_v14 = vshll.u32 %v3128_v63, 16  ;;  %v474_v16 = vshll.u32 %v3130_v1, 16  ;;  %v473_v38 = vshrl.u32 %v3128_v63, 16  ;;  %v2050_v44 = vor.u32 %v2531_v18, %v2049_v17 }
  0xc7   : > { %v450_v6 = vshll.u32 %v3124_v56, 16  ;;  %v451_v8 = vshrl.u32 %v3124_v56, 16  ;;  %v452_v9 = vshll.u32 %v3126_v57, 16  ;;  %v453_v10 = vshrl.u32 %v3126_v57, 16  ;;  %v2043_v56 = vld [vmem:[#allocation5 + $0xb8] sm:$0xf0] }
  0xc8   : > { %vm476_vm6 = vc.u32 %v468_v12, %v472_v14  ;;  %v478_v26 = vadd.s32 %v472_v14, %v468_v12  ;;  %v431_v48 = vsel %vm427_vm3, %v3090_v33, %v430_v53  ;;  %v2058_v50 = vor.u32 %v2532_v28, %v2057_v24  ;;  %929 = vmatpush.bf16.msra.mxu0 %v2050_v44  ;;  %v2019_v33 = vld [vmem:[#allocation5 + $0x90] sm:$0xf0]  ;;  %v2522_v12 = vld [vmem:[#allocation5 + $0x8c] sm:$0xf]  ;;  %v2001_v14 = vld [vmem:[#allocation5 + $0x60] sm:$0xf] }
  0xc9   : > { %vm454_vm5 = vc.u32 %v446_v61, %v450_v6  ;;  %v456_v19 = vadd.s32 %v450_v6, %v446_v61  ;;  %v477_v31 = vsel %vm476_vm6, 1, %v2902_v0  ;;  %v2062_v51 = vor.u32 %v2530_v29, %v2059_v34  ;;  %v2017_v61 = vld [vmem:[#allocation5 + $0x80] sm:$0xf]  ;;  %943 = vmatpush.bf16.msra.mxu1 %v2038_v60  ;;  %v2518_v24 = vld [vmem:[#allocation5 + $0x6c] sm:$0xf] }
  0xca   : > { %v455_v25 = vsel %vm454_vm5, 1, %v2902_v0  ;;  %v479_v39 = vadd.s32 %v477_v31, %v471_v13  ;;  %vm480_vm8 = vc.u32 %v478_v26, %v474_v16  ;;  %v475_v59 = vshrl.u32 %v3130_v1, 16  ;;  %955 = vmatpush.bf16.msra.mxu2 %v2058_v50  ;;  %v2025_v1 = vld [vmem:[#allocation5 + $0x88] sm:$0xf]  ;;  %v2027_v13 = vld [vmem:[#allocation5 + $0x98] sm:$0xf0] }
  0xcb   : > { %v457_v30 = vadd.s32 %v455_v25, %v449_v62  ;;  %vm458_vm7 = vc.u32 %v456_v19, %v452_v9  ;;  %v481_v43 = vsel %vm480_vm8, 1, %v2902_v0  ;;  %v2042_v63 = vor.u32 %v2528_v52, %v2041_v47  ;;  %968 = vmatpush.bf16.msra.mxu3 %v2062_v51  ;;  %v2517_v19 = vld [vmem:[#allocation5 + $0x64] sm:$0xf]  ;;  %v2011_v25 = vld [vmem:[#allocation5 + $0x78] sm:$0xf0] }
  0xcc   : > { %v459_v37 = vsel %vm458_vm7, 1, %v2902_v0  ;;  %v483_v49 = vadd.s32 %v481_v43, %v479_v39  ;;  %v2034_v0 = vor.u32 %v2527_v40, %v2033_v36  ;;  %v3151_v5 = vadd.s32 %v478_v26, %v474_v16  ;;  %v2519_v16 = vld [vmem:[#allocation5 + $0x6c] sm:$0xf0]  ;;  %v1985_v29 = vld [vmem:[#allocation5 + $0x40] sm:$0xf] }
  0xcd   : > { %v461_v42 = vadd.s32 %v459_v37, %v457_v30  ;;  %v2046_v6 = vor.u32 %v2526_v54, %v2043_v56  ;;  %v432_v9 = vsel %vm426_vm4, %v3122_v55, %v431_v48  ;;  %v2018_v57 = vor.u32 %v2523_v2, %v2017_v61  ;;  %v2515_v31 = vld [vmem:[#allocation5 + $0x4c] sm:$0xf0]  ;;  %v1993_v37 = vld [vmem:[#allocation5 + $0x48] sm:$0xf]  ;;  %v2514_v39 = vld [vmem:[#allocation5 + $0x4c] sm:$0xf] }
  0xce   : > { %v484_v62 = vadd.s32 %v483_v49, %v473_v38  ;;  %930 = vmatpush.bf16.msra.mxu0 %v2034_v0  ;;  %956 = vmatpush.bf16.msra.mxu2 %v2042_v63  ;;  %v486_v15 = vmul.u32 %v3092_v35, %v432_v9  ;;  %v2030_v55 = vor.u32 %v2522_v12, %v2027_v13  ;;  %v2513_v35 = vld [vmem:[#allocation5 + $0x44] sm:$0xf]  ;;  %v2516_v38 = vld [vmem:[#allocation5 + $0x54] sm:$0xf0]  ;;  %v1995_v40 = vld [vmem:[#allocation5 + $0x58] sm:$0xf0] }
  0xcf   : > { %v462_v58 = vadd.s32 %v461_v42, %v451_v8  ;;  %v2524_v8 = vld [vmem:[#allocation5 + $0x94] sm:$0xf0]  ;;  %969 = vmatpush.bf16.msra.mxu3 %v2046_v6  ;;  %v2002_v27 = vor.u32 %v2519_v16, %v2001_v14  ;;  %v2006_v28 = vor.u32 %v2517_v19, %v2003_v20  ;;  %v2010_v30 = vor.u32 %v2520_v22, %v2009_v21  ;;  %v1969_v44 = vld [vmem:[#allocation5 + $0x20] sm:$0xf]  ;;  %v2509_v47 = vld [vmem:[#allocation5 + $0x24] sm:$0xf] }
  0xd0   : > { %v485_v11 = vadd.s32 %v484_v62, %v475_v59  ;;  %v2026_v18 = vor.u32 %v2524_v8, %v2025_v1  ;;  %v2014_v36 = vor.u32 %v2518_v24, %v2011_v25  ;;  %v1986_v42 = vor.u32 %v2515_v31, %v1985_v29  ;;  %v1971_v48 = vld [vmem:[#allocation5 + $0x30] sm:$0xf0]  ;;  %v1977_v51 = vld [vmem:[#allocation5 + $0x28] sm:$0xf]  ;;  %v2512_v52 = vld [vmem:[#allocation5 + $0x34] sm:$0xf0] }
  0xd1   : > { %v3149_v53 = vadd.s32 %v462_v58, %v453_v10  ;;  %v2022_v10 = vor.u32 %v2521_v3, %v2019_v33  ;;  %v1990_v43 = vor.u32 %v2513_v35, %v1987_v32  ;;  %v1994_v45 = vor.u32 %v2516_v38, %v1993_v37  ;;  %v2510_v54 = vld [vmem:[#allocation5 + $0x2c] sm:$0xf]  ;;  %v1979_v56 = vld [vmem:[#allocation5 + $0x38] sm:$0xf0]  ;;  %v1953_v60 = vld [vmem:[#allocation5] sm:$0xf] }
  0xd2   : > { %v489_v17 = vadd.s32 1, %v485_v11  ;;  %931 = vmatpush.bf16.msra.mxu0 %v2018_v57  ;;  %957 = vmatpush.bf16.msra.mxu2 %v2026_v18  ;;  %v1998_v50 = vor.u32 %v2514_v39, %v1995_v40  ;;  %v1970_v59 = vor.u32 %v2511_v46, %v1969_v44  ;;  %v1974_v0 = vor.u32 %v2509_v47, %v1971_v48  ;;  %v2507_v61 = vld [vmem:[#allocation5 + $0xc] sm:$0xf0]  ;;  %v2505_v63 = vld [vmem:[#allocation5 + $0x4] sm:$0xf] }
  0xd3   : > { %vm488_vm9 = vc.u32 %v3149_v53, %v3151_v5  ;;  %944 = vmatpush.bf16.msra.mxu1 %v2022_v10  ;;  %970 = vmatpush.bf16.msra.mxu3 %v2030_v55  ;;  %v1978_v62 = vor.u32 %v2512_v52, %v1977_v51  ;;  %v1955_v2 = vld [vmem:[#allocation5 + $0x10] sm:$0xf0]  ;;  %v1961_v3 = vld [vmem:[#allocation5 + $0x8] sm:$0xf]  ;;  %v1982_v6 = vor.u32 %v2510_v54, %v1979_v56  ;;  %v2508_v1 = vld [vmem:[#allocation5 + $0x14] sm:$0xf0] }
  0xd4   : > { %v490_v23 = vsel %vm488_vm9, %v489_v17, %v485_v11  ;;  %v2506_v8 = vld [vmem:[#allocation5 + $0xc] sm:$0xf]  ;;  %v1963_v9 = vld [vmem:[#allocation5 + $0x18] sm:$0xf0]  ;;  %v2193_v11 = vld [vmem:[#allocation2 + $0xe0] sm:$0xf]  ;;  %v1954_v57 = vor.u32 %v2507_v61, %v1953_v60  ;;  %v1958_v10 = vor.u32 %v2505_v63, %v1955_v2  ;;  %v1962_v19 = vor.u32 %v2508_v1, %v1961_v3 }
  0xd5   : > { %v491_v26 = vadd.s32 %v490_v23, %v486_v15  ;;  %v2503_v12 = vld [vmem:[#allocation2 + $0xec] sm:$0xf0]  ;;  %v2501_v14 = vld [vmem:[#allocation2 + $0xe4] sm:$0xf]  ;;  %v2195_v16 = vld [vmem:[#allocation2 + $0xf0] sm:$0xf0]  ;;  %v1966_v22 = vor.u32 %v2506_v8, %v1963_v9  ;;  %v487_v38 = vadd.s32 %v3151_v5, %v3149_v53 }
  0xd6   : > { %932 = vmatpush.bf16.msra.mxu0 %v2002_v27  ;;  %958 = vmatpush.bf16.msra.mxu2 %v2010_v30  ;;  %v2201_v17 = vld [vmem:[#allocation2 + $0xe8] sm:$0xf]  ;;  %v2194_v20 = vor.u32 %v2503_v12, %v2193_v11  ;;  %v2504_v15 = vld [vmem:[#allocation2 + $0xf4] sm:$0xf0]  ;;  %v2502_v55 = vld [vmem:[#allocation2 + $0xec] sm:$0xf]  ;;  %v2198_v23 = vor.u32 %v2501_v14, %v2195_v16 }
  0xd7   : > { %v492_v34 = vadd.s32 536870912, %v491_v26  ;;  %945 = vmatpush.bf16.msra.mxu1 %v2006_v28  ;;  %971 = vmatpush.bf16.msra.mxu3 %v2014_v36  ;;  %v2203_v21 = vld [vmem:[#allocation2 + $0xf8] sm:$0xf0]  ;;  %v2177_v24 = vld [vmem:[#allocation2 + $0xc0] sm:$0xf]  ;;  %v2202_v28 = vor.u32 %v2504_v15, %v2201_v17 }
  0xd8   : > { %v2499_v25 = vld [vmem:[#allocation2 + $0xcc] sm:$0xf0]  ;;  %v2206_v29 = vor.u32 %v2502_v55, %v2203_v21  ;;  %v2179_v30 = vld [vmem:[#allocation2 + $0xd0] sm:$0xf0]  ;;  %v2185_v31 = vld [vmem:[#allocation2 + $0xc8] sm:$0xf] }
  0xd9   : > { %v3162_v41 = vshrl.u32 %v492_v34, 30  ;;  %v2500_v35 = vld [vmem:[#allocation2 + $0xd4] sm:$0xf0]  ;;  %v2498_v32 = vld [vmem:[#allocation2 + $0xcc] sm:$0xf]  ;;  %v2178_v36 = vor.u32 %v2499_v25, %v2177_v24 }
  0xda   : > { %933 = vmatpush.bf16.msra.mxu0 %v1986_v42  ;;  %959 = vmatpush.bf16.msra.mxu2 %v1994_v45  ;;  %v2187_v34 = vld [vmem:[#allocation2 + $0xd8] sm:$0xf0]  ;;  %v2161_v37 = vld [vmem:[#allocation2 + $0xa0] sm:$0xf]  ;;  %v2495_v42 = vld [vmem:[#allocation2 + $0xac] sm:$0xf0]  ;;  %v2186_v46 = vor.u32 %v2500_v35, %v2185_v31 }
  0xdb   : > { %v494_v49 = vshll.u32 %v3162_v41, 30  ;;  %946 = vmatpush.bf16.msra.mxu1 %v1990_v43  ;;  %972 = vmatpush.bf16.msra.mxu3 %v1998_v50  ;;  %v2493_v43 = vld [vmem:[#allocation2 + $0xa4] sm:$0xf]  ;;  %v2190_v47 = vor.u32 %v2498_v32, %v2187_v34  ;;  %v2163_v48 = vld [vmem:[#allocation2 + $0xb0] sm:$0xf0]  ;;  %v2162_v56 = vor.u32 %v2495_v42, %v2161_v37 }
  0xdc   : > { %v2496_v50 = vld [vmem:[#allocation2 + $0xb4] sm:$0xf0]  ;;  %v2494_v51 = vld [vmem:[#allocation2 + $0xac] sm:$0xf]  ;;  %v2171_v52 = vld [vmem:[#allocation2 + $0xb8] sm:$0xf0] }
  0xdd   : > { %v3165_v58 = vsub.s32 %v491_v26, %v494_v49  ;;  %v2497_v26 = vld [vmem:[#allocation2 + $0xc4] sm:$0xf]  ;;  %v2169_v49 = vld [vmem:[#allocation2 + $0xa8] sm:$0xf]  ;;  %v2491_v60 = vld [vmem:[#allocation2 + $0x8c] sm:$0xf0]  ;;  %v2174_v3 = vor.u32 %v2494_v51, %v2171_v52 }
  0xde   : > { %934 = vmatpush.bf16.msra.mxu0 %v1970_v59  ;;  %960 = vmatpush.bf16.msra.mxu2 %v1978_v62  ;;  %v2182_v40 = vor.u32 %v2497_v26, %v2179_v30  ;;  %v2166_v59 = vor.u32 %v2493_v43, %v2163_v48  ;;  %v2489_v61 = vld [vmem:[#allocation2 + $0x84] sm:$0xf]  ;;  %v2170_v2 = vor.u32 %v2496_v50, %v2169_v49  ;;  %v2492_v1 = vld [vmem:[#allocation2 + $0x94] sm:$0xf0]  ;;  %v2490_v8 = vld [vmem:[#allocation2 + $0x8c] sm:$0xf] }
  0xdf   : > { %vm496_vm10 = vcmp.lt.s32.totalorder %v3165_v58, 0  ;;  %v497_v33 = vsub.s32 0, %v3165_v58  ;;  %947 = vmatpush.bf16.msra.mxu1 %v1974_v0  ;;  %973 = vmatpush.bf16.msra.mxu3 %v1982_v6  ;;  %v2145_v0 = vld [vmem:[#allocation2 + $0x80] sm:$0xf]  ;;  %v2153_v6 = vld [vmem:[#allocation2 + $0x88] sm:$0xf] }
  0xe0   : > { %v2146_v11 = vor.u32 %v2491_v60, %v2145_v0  ;;  %v2129_v16 = vld [vmem:[#allocation2 + $0x60] sm:$0xf]  ;;  %v2487_v17 = vld [vmem:[#allocation2 + $0x6c] sm:$0xf0]  ;;  %v2488_v21 = vld [vmem:[#allocation2 + $0x74] sm:$0xf0] }
  0xe1   : > { %v498_v13 = vsel %vm496_vm10, %v497_v33, %v3165_v58  ;;  %v2147_v33 = vld [vmem:[#allocation2 + $0x90] sm:$0xf0]  ;;  %v2130_v55 = vor.u32 %v2487_v17, %v2129_v16  ;;  %v2113_v25 = vld [vmem:[#allocation2 + $0x40] sm:$0xf]  ;;  %v2483_v26 = vld [vmem:[#allocation2 + $0x4c] sm:$0xf0] }
  0xe2   : > { %v499_v18 = vclz %v498_v13  ;;  %935 = vmatpush.bf16.msra.mxu0 %v1954_v57  ;;  %961 = vmatpush.bf16.msra.mxu2 %v1962_v19  ;;  %v2150_v12 = vor.u32 %v2489_v61, %v2147_v33  ;;  %v2131_v19 = vld [vmem:[#allocation2 + $0x70] sm:$0xf0]  ;;  %v2121_v35 = vld [vmem:[#allocation2 + $0x48] sm:$0xf]  ;;  %v2484_v32 = vld [vmem:[#allocation2 + $0x54] sm:$0xf0] }
  0xe3   : > { %948 = vmatpush.bf16.msra.mxu1 %v1958_v10  ;;  %974 = vmatpush.bf16.msra.mxu3 %v1966_v22  ;;  %v2154_v10 = vor.u32 %v2492_v1, %v2153_v6  ;;  %v2486_v22 = vld [vmem:[#allocation2 + $0x6c] sm:$0xf]  ;;  %v2115_v31 = vld [vmem:[#allocation2 + $0x50] sm:$0xf0]  ;;  %v2122_v7 = vor.u32 %v2484_v32, %v2121_v35  ;;  %v2477_v48 = vld [vmem:[#allocation2 + $0x24] sm:$0xf] }
  0xe4   : > { %v1946_v27 = vadd.s32 4294967294, %v499_v18  ;;  %v2485_v18 = vld [vmem:[#allocation2 + $0x64] sm:$0xf]  ;;  %v2482_v34 = vld [vmem:[#allocation2 + $0x4c] sm:$0xf] }
  0xe5   : > { %v2134_v24 = vor.u32 %v2485_v18, %v2131_v19  ;;  %v2099_v49 = vld [vmem:[#allocation2 + $0x30] sm:$0xf0]  ;;  %v2105_v50 = vld [vmem:[#allocation2 + $0x28] sm:$0xf]  ;;  %v2480_v51 = vld [vmem:[#allocation2 + $0x34] sm:$0xf0] }
  0xe6   : > { %vm1947_vm11 = vcmp.lt.s32.totalorder %v1946_v27, 0  ;;  %1140 = vmatpush.bf16.msrb.mxu0 %v2194_v20  ;;  %1166 = vmatpush.bf16.msrb.mxu2 %v2202_v28  ;;  %v2137_v20 = vld [vmem:[#allocation2 + $0x68] sm:$0xf]  ;;  %v2478_v52 = vld [vmem:[#allocation2 + $0x2c] sm:$0xf]  ;;  %v2102_v60 = vor.u32 %v2477_v48, %v2099_v49  ;;  %v2106_v33 = vor.u32 %v2480_v51, %v2105_v50 }
  0xe7   : > { %v502_v39 = vsel %vm1947_vm11, 0, %v1946_v27  ;;  %1153 = vmatpush.bf16.msrb.mxu1 %v2198_v23  ;;  %1179 = vmatpush.bf16.msrb.mxu3 %v2206_v29  ;;  %v2139_v23 = vld [vmem:[#allocation2 + $0x78] sm:$0xf0]  ;;  %v2481_v27 = vld [vmem:[#allocation2 + $0x44] sm:$0xf]  ;;  %v2138_v29 = vor.u32 %v2488_v21, %v2137_v20 }
  0xe8   : > { %v503_v44 = vsub.s32 32, %v502_v39  ;;  %v507_v45 = vsub.s32 4294967266, %v502_v39  ;;  %v504_v54 = vshll.u32 %v3165_v58, %v502_v39  ;;  %v2155_v58 = vld [vmem:[#allocation2 + $0x98] sm:$0xf0]  ;;  %v2142_v30 = vor.u32 %v2486_v22, %v2139_v23  ;;  %v2475_v61 = vld [vmem:[#allocation2 + $0xc] sm:$0xf0] }
  0xe9   : > { %v2158_v14 = vor.u32 %v2490_v8, %v2155_v58  ;;  %v2114_v39 = vor.u32 %v2483_v26, %v2113_v25  ;;  %v2118_v43 = vor.u32 %v2481_v27, %v2115_v31  ;;  %v2089_v1 = vld [vmem:[#allocation2 + $0x8] sm:$0xf]  ;;  %v2476_v8 = vld [vmem:[#allocation2 + $0x14] sm:$0xf0]  ;;  %v2474_v58 = vld [vmem:[#allocation2 + $0xc] sm:$0xf] }
  0xea   : > { %v505_v53 = vshrl.u32 %v487_v38, %v503_v44  ;;  %v508_v5 = vadd.s32 127, %v507_v45  ;;  %1141 = vmatpush.bf16.msrb.mxu0 %v2178_v36  ;;  %1167 = vmatpush.bf16.msrb.mxu2 %v2186_v46  ;;  %v2123_v36 = vld [vmem:[#allocation2 + $0x58] sm:$0xf0]  ;;  %v2097_v44 = vld [vmem:[#allocation2 + $0x20] sm:$0xf]  ;;  %v2090_v16 = vor.u32 %v2476_v8, %v2089_v1 }
  0xeb   : > { %1154 = vmatpush.bf16.msrb.mxu1 %v2182_v40  ;;  %1180 = vmatpush.bf16.msrb.mxu3 %v2190_v47  ;;  %v517_v40 = vsub.s32 4, %v3162_v41  ;;  %v2479_v45 = vld [vmem:[#allocation2 + $0x2c] sm:$0xf0]  ;;  %v2126_v47 = vor.u32 %v2482_v34, %v2123_v36  ;;  %v2552_v37 = vld [vmem:[%s3069_s29 + $0x74] sm:$0xf0] }
  0xec   : > { %v506_v62 = vor.u32 %v505_v53, %v504_v54  ;;  %v509_v63 = vshll.u32 %v508_v5, 23  ;;  %v2107_v54 = vld [vmem:[#allocation2 + $0x38] sm:$0xf0]  ;;  %v2269_v36 = vld [vmem:[%s3069_s29 + $0x70] sm:$0xf] }
  0xed   : > { %v518_v0 = vsel %vm395_vm12, %v517_v40, %v3162_v41  ;;  %v2110_v6 = vor.u32 %v2478_v52, %v2107_v54  ;;  %v2568_v40 = vld [vmem:[%s3069_s29 + $0xf4] sm:$0xf0]  ;;  %v2397_v48 = vld [vmem:[%s3069_s29 + $0x170] sm:$0xf]  ;;  %v2546_v1 = vld [vmem:[%s3069_s29 + $0x44] sm:$0xf0] }
  0xee   : > { %v510_v9 = vor.u32 4788187, %v509_v63  ;;  %1142 = vmatpush.bf16.msrb.mxu0 %v2162_v56  ;;  %v513_v57 = vcvt.s32.f32 %v506_v62  ;;  %1168 = vmatpush.bf16.msrb.mxu2 %v2170_v2  ;;  %v2098_v56 = vor.u32 %v2479_v45, %v2097_v44  ;;  %v2473_v62 = vld [vmem:[#allocation2 + $0x4] sm:$0xf]  ;;  %v2083_v63 = vld [vmem:[#allocation2 + $0x10] sm:$0xf0] }
  0xef   : > { %1155 = vmatpush.bf16.msrb.mxu1 %v2166_v59  ;;  %1181 = vmatpush.bf16.msrb.mxu3 %v2174_v3  ;;  %v2081_v59 = vld [vmem:[#allocation2] sm:$0xf]  ;;  %v2584_v49 = vld [vmem:[%s3069_s29 + $0x174] sm:$0xf0]  ;;  %v2461_v50 = vld [vmem:[%s3069_s29 + $0x1f0] sm:$0xf] }
  0xf0   : > { %v511_v13 = vand.u32 2147483647, %v510_v9  ;;  %v2091_v9 = vld [vmem:[#allocation2 + $0x18] sm:$0xf0]  ;;  %v2325_v45 = vld [vmem:[%s3069_s29 + $0xe0] sm:$0xf]  ;;  %v2398_v51 = vor.u32 %v2584_v49, %v2397_v48 }
  0xf1   : > { %v2094_v17 = vor.u32 %v2474_v58, %v2091_v9  ;;  %v2600_v52 = vld [vmem:[%s3069_s29 + $0x1f4] sm:$0xf0]  ;;  %v2309_v8 = vld [vmem:[%s3069_s29 + $0xc0] sm:$0xf] }
  0xf2   : > { %v514_v15 = vmul.f32 %v513_v57, %v511_v13  ;;  %1143 = vmatpush.bf16.msrb.mxu0 %v2146_v11  ;;  %1169 = vmatpush.bf16.msrb.mxu2 %v2154_v10  ;;  %v520_v11 = vsel %vm3176_vm13, 0, %v518_v0  ;;  %v2082_v13 = vor.u32 %v2475_v61, %v2081_v59  ;;  %v2086_v57 = vor.u32 %v2473_v62, %v2083_v63  ;;  %v2564_v0 = vld [vmem:[%s3069_s29 + $0xd4] sm:$0xf0]  ;;  %v2389_v61 = vld [vmem:[%s3069_s29 + $0x160] sm:$0xf] }
  0xf3   : > { %1156 = vmatpush.bf16.msrb.mxu1 %v2150_v12  ;;  %1182 = vmatpush.bf16.msrb.mxu3 %v2158_v14  ;;  %v692_v18 = vadd.s32 3, %v520_v11  ;;  %v2462_v54 = vor.u32 %v2600_v52, %v2461_v50  ;;  %v2582_v62 = vld [vmem:[%s3069_s29 + $0x164] sm:$0xf0]  ;;  %v2453_v63 = vld [vmem:[%s3069_s29 + $0x1e0] sm:$0xf] }
  0xf4   : > { %v515_v28 = vxor.u32 2147483648, %v514_v15  ;;  %v2556_v49 = vld [vmem:[%s3069_s29 + $0x94] sm:$0xf0]  ;;  %v2574_v52 = vld [vmem:[%s3069_s29 + $0x124] sm:$0xf0] }
  0xf5   : > { %v693_v21 = vand.u32 3, %v692_v18  ;;  %v2237_v18 = vld [vmem:[%s3069_s29 + $0x30] sm:$0xf] }
  0xf6   : > { %v516_v38 = vsel %vm395_vm12, %v515_v28, %v514_v15  ;;  %1144 = vmatpush.bf16.msrb.mxu0 %v2130_v55  ;;  %1170 = vmatpush.bf16.msrb.mxu2 %v2138_v29 }
  0xf7   : > { %v519_v42 = vsel %vm3176_vm13, %v3082_v4, %v516_v38  ;;  %1157 = vmatpush.bf16.msrb.mxu1 %v2134_v24  ;;  %1183 = vmatpush.bf16.msrb.mxu3 %v2142_v30  ;;  %vm695_vm14 = vcmp.eq.s32.totalorder %v693_v21, 0  ;;  %vm698_vm15 = vcmp.eq.s32.totalorder %v693_v21, 2  ;;  %vm694_vm0 = vcmp.lt.s32.totalorder %v693_v21, 2  ;;  %v2333_v38 = vld [vmem:[%s3069_s29 + $0xf0] sm:$0xf] }
  0xf8   : > { %v521_v46 = vmul.f32 %v519_v42, %v519_v42  ;;  %v537_v30 = vand.u32 3, %v520_v11  ;;  %v2334_v44 = vor.u32 %v2568_v40, %v2333_v38  ;;  %v2365_v38 = vld [vmem:[%s3069_s29 + $0x130] sm:$0xf] }
  0xf9   : > { %v2429_v40 = vld [vmem:[%s3069_s29 + $0x1b0] sm:$0xf] }
  0xfa   : > { %v529_v53 = vmul.f32 -0.00019511016, %v521_v46  ;;  %v522_v5 = vmul.f32 -0.001358992, %v521_v46  ;;  %1145 = vmatpush.bf16.msrb.mxu0 %v2114_v39  ;;  %1171 = vmatpush.bf16.msrb.mxu2 %v2122_v7  ;;  %vm539_vm2 = vcmp.eq.s32.totalorder %v537_v30, 0  ;;  %vm542_vm3 = vcmp.eq.s32.totalorder %v537_v30, 2 }
  0xfb   : > { %1158 = vmatpush.bf16.msrb.mxu1 %v2118_v43  ;;  %1184 = vmatpush.bf16.msrb.mxu3 %v2126_v47  ;;  %vm538_vm4 = vcmp.lt.s32.totalorder %v537_v30, 2  ;;  %v2270_v39 = vor.u32 %v2552_v37, %v2269_v36  ;;  %v2550_v43 = vld [vmem:[%s3069_s29 + $0x64] sm:$0xf0]  ;;  %v2229_v30 = vld [vmem:[%s3069_s29 + $0x20] sm:$0xf] }
  0xfc   : > { %v530_v2 = vadd.f32 0.008332121, %v529_v53  ;;  %v523_v3 = vadd.f32 0.041655596, %v522_v5  ;;  %v2253_v53 = vld [vmem:[%s3069_s29 + $0x50] sm:$0xf] }
  0xfd   : > { %v2548_v5 = vld [vmem:[%s3069_s29 + $0x54] sm:$0xf0]  ;;  %v2558_v36 = vld [vmem:[%s3069_s29 + $0xa4] sm:$0xf0] }
  0xfe   : > { %v531_v12 = vmul.f32 %v530_v2, %v521_v46  ;;  %v524_v41 = vmul.f32 %v523_v3, %v521_v46  ;;  %1146 = vmatpush.bf16.msrb.mxu0 %v2098_v56  ;;  %1172 = vmatpush.bf16.msrb.mxu2 %v2106_v33  ;;  %v2317_v56 = vld [vmem:[%s3069_s29 + $0xd0] sm:$0xf]  ;;  %v2254_v59 = vor.u32 %v2548_v5, %v2253_v53  ;;  %v2598_v3 = vld [vmem:[%s3069_s29 + $0x1e4] sm:$0xf0] }
  0xff   : > { %1159 = vmatpush.bf16.msrb.mxu1 %v2102_v60  ;;  %1185 = vmatpush.bf16.msrb.mxu3 %v2110_v6  ;;  %v2318_v60 = vor.u32 %v2564_v0, %v2317_v56  ;;  %v2390_v2 = vor.u32 %v2582_v62, %v2389_v61  ;;  %v2454_v33 = vor.u32 %v2598_v3, %v2453_v63  ;;  %v2245_v6 = vld [vmem:[%s3069_s29 + $0x40] sm:$0xf]  ;;  %v2590_v0 = vld [vmem:[%s3069_s29 + $0x1a4] sm:$0xf0] }
 0x100   : > { %v532_v10 = vadd.f32 -0.16666654, %v531_v12  ;;  %v525_v14 = vadd.f32 -0.4999988, %v524_v41  ;;  %v2246_v11 = vor.u32 %v2546_v1, %v2245_v6  ;;  %v2562_v12 = vld [vmem:[%s3069_s29 + $0xc4] sm:$0xf0] }
 0x101   : > { %v2310_v41 = vor.u32 %v2562_v12, %v2309_v8  ;;  %v2213_v63 = vld [vmem:[%s3069_s29] sm:$0xf]  ;;  %v2554_v8 = vld [vmem:[%s3069_s29 + $0x84] sm:$0xf0]  ;;  %v2271_v12 = vld [vmem:[%s3069_s29 + $0x78] sm:$0xf0] }
 0x102   : > { %v533_v19 = vmul.f32 %v532_v10, %v521_v46  ;;  %v526_v20 = vmul.f32 %v525_v14, %v521_v46  ;;  %1147 = vmatpush.bf16.msrb.mxu0 %v2082_v13  ;;  %1173 = vmatpush.bf16.msrb.mxu2 %v2090_v16  ;;  %v2566_v46 = vld [vmem:[%s3069_s29 + $0xe4] sm:$0xf0]  ;;  %v2381_v13 = vld [vmem:[%s3069_s29 + $0x150] sm:$0xf]  ;;  %v2596_v16 = vld [vmem:[%s3069_s29 + $0x1d4] sm:$0xf0] }
 0x103   : > { %1160 = vmatpush.bf16.msrb.mxu1 %v2086_v57  ;;  %1186 = vmatpush.bf16.msrb.mxu3 %v2094_v17  ;;  %v2326_v47 = vor.u32 %v2566_v46, %v2325_v45  ;;  %v2580_v57 = vld [vmem:[%s3069_s29 + $0x154] sm:$0xf0]  ;;  %v2445_v10 = vld [vmem:[%s3069_s29 + $0x1d0] sm:$0xf]  ;;  %v2277_v3 = vld [vmem:[%s3069_s29 + $0x80] sm:$0xf] }
 0x104   : > { %v534_v15 = vadd.f32 1.0, %v533_v19  ;;  %v527_v55 = vadd.f32 1.0, %v526_v20  ;;  %v2382_v14 = vor.u32 %v2580_v57, %v2381_v13  ;;  %v2446_v17 = vor.u32 %v2596_v16, %v2445_v10  ;;  %v2544_v19 = vld [vmem:[%s3069_s29 + $0x34] sm:$0xf0]  ;;  %v2301_v20 = vld [vmem:[%s3069_s29 + $0xb0] sm:$0xf] }
 0x105   : > { %v2221_v46 = vld [vmem:[%s3069_s29 + $0x10] sm:$0xf]  ;;  %v2278_v57 = vor.u32 %v2554_v8, %v2277_v3  ;;  %v2335_v16 = vld [vmem:[%s3069_s29 + $0xf8] sm:$0xf0]  ;;  %v2561_v8 = vld [vmem:[%s3069_s29 + $0xc4] sm:$0xf] }
 0x106   : > { %v535_v22 = vmul.f32 %v534_v15, %v519_v42  ;;  %v543_v23 = vxor.u32 2147483648, %v527_v55  ;;  %v2261_v42 = vld [vmem:[%s3069_s29 + $0x60] sm:$0xf]  ;;  %v2238_v15 = vor.u32 %v2544_v19, %v2237_v18  ;;  %v2572_v19 = vld [vmem:[%s3069_s29 + $0x114] sm:$0xf0] }
 0x107   : > { %v2262_v7 = vor.u32 %v2550_v43, %v2261_v42  ;;  %v3246_v42 = vld [vmem:[%s3486_s4] sm:$0xf] }
 0x108   : > { %v540_v24 = vxor.u32 2147483648, %v535_v22  ;;  %v700_v26 = vsel %vm698_vm15, %v543_v23, %v535_v22  ;;  %v544_v35 = vsel %vm542_vm3, %v543_v23, %v535_v22  ;;  %v2373_v22 = vld [vmem:[%s3069_s29 + $0x140] sm:$0xf]  ;;  %v2578_v23 = vld [vmem:[%s3069_s29 + $0x144] sm:$0xf0]  ;;  %v1194_v53 = vperm.slane %v3246_v42, 0 }
 0x109   : > { %v1195_v5 = vperm.slane %v3246_v42, 1  ;;  %v1196_v56 = vperm.slane %v3246_v42, 2 }
 0x10a   : > { %v697_v25 = vsel %vm695_vm14, %v527_v55, %v540_v24  ;;  %v541_v31 = vsel %vm539_vm2, %v527_v55, %v540_v24  ;;  %v2560_v55 = vld [vmem:[%s3069_s29 + $0xb4] sm:$0xf0]  ;;  %v2437_v24 = vld [vmem:[%s3069_s29 + $0x1c0] sm:$0xf] }
 0x10b   : > { %v701_v27 = vsel %vm694_vm0, %v697_v25, %v700_v26  ;;  %v545_v4 = vsel %vm538_vm4, %v541_v31, %v544_v35  ;;  %v2302_v21 = vor.u32 %v2560_v55, %v2301_v20  ;;  %v2374_v25 = vor.u32 %v2578_v23, %v2373_v22  ;;  %v2594_v26 = vld [vmem:[%s3069_s29 + $0x1c4] sm:$0xf0]  ;;  %v2293_v35 = vld [vmem:[%s3069_s29 + $0xa0] sm:$0xf]  ;;  %v2413_v20 = vld [vmem:[%s3069_s29 + $0x190] sm:$0xf] }
 0x10c   : > { %v702_v28 = vsel %vm536_vm1, nan, %v701_v27  ;;  %v546_v32 = vsel %vm536_vm1, nan, %v545_v4  ;;  %v2542_v31 = vld [vmem:[%s3069_s29 + $0x24] sm:$0xf0]  ;;  %v2294_v37 = vor.u32 %v2558_v36, %v2293_v35  ;;  %v2549_v23 = vld [vmem:[%s3069_s29 + $0x64] sm:$0xf] }
 0x10d   : > { %v703_v29 = vpack.c.bf16 %v702_v28, %v702_v28  ;;  %v547_v34 = vpack.c.bf16 %v546_v32, %v546_v32 }
 0x10f   : > { %936 = vmatmul.bf16.vlgmr.msra.gmra.mxu0 %v703_v29  ;;  %949 = vmatmul.bf16.vlgmr.msra.gmra.mxu1 %v703_v29 }
 0x110   : > { %962 = vmatmul.bf16.vlgmr.msra.gmra.mxu2 %v703_v29  ;;  %975 = vmatmul.bf16.vlgmr.msra.gmra.mxu3 %v703_v29  ;;  %v2438_v29 = vor.u32 %v2594_v26, %v2437_v24  ;;  %v2263_v24 = vld [vmem:[%s3069_s29 + $0x68] sm:$0xf0] }
 0x111   : > { %1680 = vmatpush.bf16.msra.mxu0 %v2270_v39  ;;  %1693 = vmatpush.bf16.msra.mxu1 %v2334_v44  ;;  %v2576_v39 = vld [vmem:[%s3069_s29 + $0x134] sm:$0xf0] }
 0x112   : > { %1706 = vmatpush.bf16.msra.mxu2 %v2398_v51  ;;  %1719 = vmatpush.bf16.msra.mxu3 %v2462_v54  ;;  %v2366_v43 = vor.u32 %v2576_v39, %v2365_v38  ;;  %v2592_v44 = vld [vmem:[%s3069_s29 + $0x1b4] sm:$0xf0]  ;;  %v2357_v51 = vld [vmem:[%s3069_s29 + $0x120] sm:$0xf]  ;;  %v2586_v39 = vld [vmem:[%s3069_s29 + $0x184] sm:$0xf0] }
 0x113   : > { %v2430_v45 = vor.u32 %v2592_v44, %v2429_v40  ;;  %v2421_v54 = vld [vmem:[%s3069_s29 + $0x1a0] sm:$0xf]  ;;  %v2583_v40 = vld [vmem:[%s3069_s29 + $0x174] sm:$0xf] }
 0x114   : > { %v2422_v62 = vor.u32 %v2590_v0, %v2421_v54  ;;  %v2255_v54 = vld [vmem:[%s3069_s29 + $0x58] sm:$0xf0] }
 0x115   : > { %1681 = vmatpush.bf16.msra.mxu0 %v2262_v7  ;;  %1694 = vmatpush.bf16.msra.mxu1 %v2326_v47  ;;  %v2540_v7 = vld [vmem:[%s3069_s29 + $0x14] sm:$0xf0]  ;;  %v2285_v47 = vld [vmem:[%s3069_s29 + $0x90] sm:$0xf] }
 0x116   : > { %1707 = vmatpush.bf16.msra.mxu2 %v2390_v2  ;;  %1720 = vmatpush.bf16.msra.mxu3 %v2454_v33  ;;  %v2222_v48 = vor.u32 %v2540_v7, %v2221_v46  ;;  %v2286_v50 = vor.u32 %v2556_v49, %v2285_v47  ;;  %v2538_v2 = vld [vmem:[%s3069_s29 + $0x4] sm:$0xf0]  ;;  %v2463_v49 = vld [vmem:[%s3069_s29 + $0x1f8] sm:$0xf0] }
 0x117   : > { %v2214_v1 = vor.u32 %v2538_v2, %v2213_v63  ;;  %v2455_v2 = vld [vmem:[%s3069_s29 + $0x1e8] sm:$0xf0] }
 0x119   : > { %1682 = vmatpush.bf16.msra.mxu0 %v2254_v59  ;;  %1695 = vmatpush.bf16.msra.mxu1 %v2318_v60  ;;  %v2358_v59 = vor.u32 %v2574_v52, %v2357_v51 }
 0x11a   : > { %1708 = vmatpush.bf16.msra.mxu2 %v2382_v14  ;;  %1721 = vmatpush.bf16.msra.mxu3 %v2446_v17  ;;  %v2567_v14 = vld [vmem:[%s3069_s29 + $0xf4] sm:$0xf]  ;;  %v2349_v17 = vld [vmem:[%s3069_s29 + $0x110] sm:$0xf] }
 0x11b   : > { %v2338_v18 = vor.u32 %v2567_v14, %v2335_v16  ;;  %v2383_v14 = vld [vmem:[%s3069_s29 + $0x158] sm:$0xf0] }
 0x11d   : > { %1683 = vmatpush.bf16.msra.mxu0 %v2246_v11  ;;  %1696 = vmatpush.bf16.msra.mxu1 %v2310_v41  ;;  %v2551_v11 = vld [vmem:[%s3069_s29 + $0x74] sm:$0xf] }
 0x11e   : > { %1709 = vmatpush.bf16.msra.mxu2 %v2374_v25  ;;  %1722 = vmatpush.bf16.msra.mxu3 %v2438_v29  ;;  %v2274_v10 = vor.u32 %v2551_v11, %v2271_v12  ;;  %v2565_v25 = vld [vmem:[%s3069_s29 + $0xe4] sm:$0xf]  ;;  %v2311_v11 = vld [vmem:[%s3069_s29 + $0xc8] sm:$0xf0] }
 0x11f   : > { %1148 = vmatmul.bf16.vlgmr.msrb.gmra.mxu0 %v547_v34  ;;  %1161 = vmatmul.bf16.vlgmr.msrb.gmra.mxu1 %v547_v34 }
 0x120   : > { %1174 = vmatmul.bf16.vlgmr.msrb.gmra.mxu2 %v547_v34  ;;  %1187 = vmatmul.bf16.vlgmr.msrb.gmra.mxu3 %v547_v34  ;;  %v2230_v34 = vor.u32 %v2542_v31, %v2229_v30  ;;  %v2266_v30 = vor.u32 %v2549_v23, %v2263_v24  ;;  %v2327_v31 = vld [vmem:[%s3069_s29 + $0xe8] sm:$0xf0]  ;;  %v2559_v24 = vld [vmem:[%s3069_s29 + $0xb4] sm:$0xf] }
 0x121   : > { %1684 = vmatpush.bf16.msra.mxu0 %v2238_v15  ;;  %1697 = vmatpush.bf16.msra.mxu1 %v2302_v21  ;;  %v2588_v15 = vld [vmem:[%s3069_s29 + $0x194] sm:$0xf0]  ;;  %v2350_v21 = vor.u32 %v2572_v19, %v2349_v17  ;;  %v2330_v35 = vor.u32 %v2565_v25, %v2327_v31  ;;  %v2303_v25 = vld [vmem:[%s3069_s29 + $0xb8] sm:$0xf0]  ;;  %v2375_v31 = vld [vmem:[%s3069_s29 + $0x148] sm:$0xf0] }
 0x122   : > { %1710 = vmatpush.bf16.msra.mxu2 %v2366_v43  ;;  %1723 = vmatpush.bf16.msra.mxu3 %v2430_v45  ;;  %v2414_v22 = vor.u32 %v2588_v15, %v2413_v20  ;;  %v2399_v43 = vld [vmem:[%s3069_s29 + $0x178] sm:$0xf0]  ;;  %v2595_v20 = vld [vmem:[%s3069_s29 + $0x1d4] sm:$0xf] }
 0x123   : > { %v2402_v51 = vor.u32 %v2583_v40, %v2399_v43  ;;  %v2447_v15 = vld [vmem:[%s3069_s29 + $0x1d8] sm:$0xf0]  ;;  %v2231_v43 = vld [vmem:[%s3069_s29 + $0x28] sm:$0xf0] }
 0x125   : > { %1685 = vmatpush.bf16.msra.mxu0 %v2230_v34  ;;  %1698 = vmatpush.bf16.msra.mxu1 %v2294_v37  ;;  %v2405_v34 = vld [vmem:[%s3069_s29 + $0x180] sm:$0xf] }
 0x126   : > { %1711 = vmatpush.bf16.msra.mxu2 %v2358_v59  ;;  %1724 = vmatpush.bf16.msra.mxu3 %v2422_v62  ;;  %v2406_v47 = vor.u32 %v2586_v39, %v2405_v34  ;;  %v2597_v62 = vld [vmem:[%s3069_s29 + $0x1e4] sm:$0xf]  ;;  %v2439_v34 = vld [vmem:[%s3069_s29 + $0x1c8] sm:$0xf0] }
 0x127   : > { %v2458_v3 = vor.u32 %v2597_v62, %v2455_v2  ;;  %v2539_v62 = vld [vmem:[%s3069_s29 + $0x14] sm:$0xf] }
 0x129   : > { %1686 = vmatpush.bf16.msra.mxu0 %v2222_v48  ;;  %1699 = vmatpush.bf16.msra.mxu1 %v2286_v50  ;;  %v2599_v48 = vld [vmem:[%s3069_s29 + $0x1f4] sm:$0xf] }
 0x12a   : > { %1712 = vmatpush.bf16.msra.mxu2 %v2350_v21  ;;  %1725 = vmatpush.bf16.msra.mxu3 %v2414_v22  ;;  %v2547_v50 = vld [vmem:[%s3069_s29 + $0x54] sm:$0xf]  ;;  %v2466_v52 = vor.u32 %v2599_v48, %v2463_v49  ;;  %v2239_v21 = vld [vmem:[%s3069_s29 + $0x38] sm:$0xf0]  ;;  %v2450_v22 = vor.u32 %v2595_v20, %v2447_v15 }
 0x12b   : > { %v2258_v59 = vor.u32 %v2547_v50, %v2255_v54  ;;  %v2575_v54 = vld [vmem:[%s3069_s29 + $0x134] sm:$0xf] }
 0x12d   : > { %1687 = vmatpush.bf16.msra.mxu0 %v2214_v1  ;;  %1700 = vmatpush.bf16.msra.mxu1 %v2278_v57  ;;  %v2247_v1 = vld [vmem:[%s3069_s29 + $0x48] sm:$0xf0]  ;;  %v2314_v57 = vor.u32 %v2561_v8, %v2311_v11  ;;  %v2287_v8 = vld [vmem:[%s3069_s29 + $0x98] sm:$0xf0]  ;;  %v2573_v11 = vld [vmem:[%s3069_s29 + $0x124] sm:$0xf] }
 0x12e   : > { %1726 = vmatpush.bf16.msra.mxu3 %v2406_v47 }
 0x131   : > { %1732 = vmatpush.bf16.msrb.mxu0 %v2274_v10  ;;  %1745 = vmatpush.bf16.msrb.mxu1 %v2338_v18  ;;  %v2579_v10 = vld [vmem:[%s3069_s29 + $0x154] sm:$0xf] }
 0x132   : > { %1771 = vmatpush.bf16.msrb.mxu3 %v2466_v52  ;;  %v2386_v19 = vor.u32 %v2579_v10, %v2383_v14  ;;  %v2295_v52 = vld [vmem:[%s3069_s29 + $0xa8] sm:$0xf0] }
 0x133   : > { %v2359_v14 = vld [vmem:[%s3069_s29 + $0x128] sm:$0xf0] }
 0x134   : > { %v2362_v15 = vor.u32 %v2573_v11, %v2359_v14 }
 0x135   : > { %1733 = vmatpush.bf16.msrb.mxu0 %v2266_v30  ;;  %1746 = vmatpush.bf16.msrb.mxu1 %v2330_v35  ;;  %v2577_v30 = vld [vmem:[%s3069_s29 + $0x144] sm:$0xf] }
 0x136   : > { %1772 = vmatpush.bf16.msrb.mxu3 %v2458_v3  ;;  %v2555_v3 = vld [vmem:[%s3069_s29 + $0x94] sm:$0xf] }
 0x137   : > { %v2290_v20 = vor.u32 %v2555_v3, %v2287_v8 }
 0x139   : > { %1734 = vmatpush.bf16.msrb.mxu0 %v2258_v59  ;;  %v2591_v59 = vld [vmem:[%s3069_s29 + $0x1b4] sm:$0xf] }
 0x13a   : > { %1773 = vmatpush.bf16.msrb.mxu3 %v2450_v22  ;;  %v2215_v22 = vld [vmem:[%s3069_s29 + $0x8] sm:$0xf0] }
 0x18c   : > { %v3215_v58 = vpop.f32.mrf.mxu0  ;;  %v3217_v9 = vpop.f32.mrf.mxu1 }
 0x193   : > { %v3232_v27 = vpop.f32.mrf.mxu2  ;;  %v3234_v28 = vpop.f32.mrf.mxu3 }
 0x194   : > { %v939_v4 = vpop.f32.mrf.mxu0  ;;  %v952_v32 = vpop.f32.mrf.mxu1 }
 0x195   : > { %v2341_v4 = vld [vmem:[%s3069_s29 + $0x100] sm:$0xf]  ;;  %v2570_v32 = vld [vmem:[%s3069_s29 + $0x104] sm:$0xf0] }
 0x196   : > { %v2342_v38 = vor.u32 %v2570_v32, %v2341_v4  ;;  %v2378_v4 = vor.u32 %v2577_v30, %v2375_v31  ;;  %v2593_v32 = vld [vmem:[%s3069_s29 + $0x1c4] sm:$0xf]  ;;  %v2279_v31 = vld [vmem:[%s3069_s29 + $0x88] sm:$0xf0] }
 0x197   : > { %v2442_v40 = vor.u32 %v2593_v32, %v2439_v34  ;;  %v2553_v30 = vld [vmem:[%s3069_s29 + $0x84] sm:$0xf]  ;;  %v2571_v34 = vld [vmem:[%s3069_s29 + $0x114] sm:$0xf] }
 0x198   : > { %1713 = vmatpush.bf16.msra.mxu2 %v2342_v38 }
 0x199   : > { %1774 = vmatpush.bf16.msrb.mxu3 %v2442_v40 }
 0x19b   : > { %v965_v60 = vpop.f32.mrf.mxu2  ;;  %v978_v61 = vpop.f32.mrf.mxu3 }
 0x19c   : > { %v1149_v33 = vpop.f32.mrf.mxu0  ;;  %v1162_v6 = vpop.f32.mrf.mxu1  ;;  %v2581_v60 = vld [vmem:[%s3069_s29 + $0x164] sm:$0xf]  ;;  %v2391_v61 = vld [vmem:[%s3069_s29 + $0x168] sm:$0xf0]  ;;  %1758 = vmatpush.bf16.msrb.mxu2 %v2402_v51 }
 0x19d   : > { %v1150_v41 = vadd.f32 %v1149_v33, %v3215_v58  ;;  %v1163_v13 = vadd.f32 %v1162_v6, %v3217_v9  ;;  %v1197_v9 = vperm.slane %v3246_v42, 3  ;;  %v2394_v63 = vor.u32 %v2581_v60, %v2391_v61  ;;  %v2545_v33 = vld [vmem:[%s3069_s29 + $0x44] sm:$0xf] }
 0x19e   : > { %v2557_v51 = vld [vmem:[%s3069_s29 + $0xa4] sm:$0xf] }
 0x19f   : > { %v3274_v55 = vadd.f32 %v1194_v53, %v1150_v41  ;;  %v3276_v58 = vadd.f32 %v1195_v5, %v1163_v13  ;;  %v2563_v53 = vld [vmem:[%s3069_s29 + $0xd4] sm:$0xf]  ;;  %v2319_v5 = vld [vmem:[%s3069_s29 + $0xd8] sm:$0xf0]  ;;  %v2250_v13 = vor.u32 %v2545_v33, %v2247_v1 }
 0x1a0   : > { %v2322_v0 = vor.u32 %v2563_v53, %v2319_v5  ;;  %1759 = vmatpush.bf16.msrb.mxu2 %v2394_v63  ;;  %v2367_v5 = vld [vmem:[%s3069_s29 + $0x138] sm:$0xf0] }
 0x1a1   : > { %v2207_v26 = vmul.f32 -1.442695, %v3274_v55  ;;  %v2208_v29 = vmul.f32 -1.442695, %v3276_v58  ;;  %1735 = vmatpush.bf16.msrb.mxu0 %v2250_v13  ;;  %v2223_v63 = vld [vmem:[%s3069_s29 + $0x18] sm:$0xf0]  ;;  %v2370_v1 = vor.u32 %v2575_v54, %v2367_v5 }
 0x1a2   : > { %1747 = vmatpush.bf16.msrb.mxu1 %v2322_v0  ;;  %v2431_v0 = vld [vmem:[%s3069_s29 + $0x1b8] sm:$0xf0]  ;;  %v2226_v10 = vor.u32 %v2539_v62, %v2223_v63  ;;  %v2343_v5 = vld [vmem:[%s3069_s29 + $0x108] sm:$0xf0] }
 0x1a3   : > { %2698 = vpow2.f32 %v2207_v26  ;;  %v1175_v36 = vpop.f32.mrf.mxu2  ;;  %v1188_v37 = vpop.f32.mrf.mxu3 }
 0x1a4   : > { %2700 = vpow2.f32 %v2208_v29  ;;  %v1176_v44 = vadd.f32 %v1175_v36, %v3232_v27  ;;  %v1189_v45 = vadd.f32 %v1188_v37, %v3234_v28  ;;  %v1151_v46 = vpop.f32.mrf.mxu0  ;;  %v1164_v7 = vpop.f32.mrf.mxu1  ;;  %1760 = vmatpush.bf16.msrb.mxu2 %v2386_v19  ;;  %v2306_v29 = vor.u32 %v2559_v24, %v2303_v25  ;;  %v2541_v36 = vld [vmem:[%s3069_s29 + $0x24] sm:$0xf] }
 0x1a5   : > { %v2234_v47 = vor.u32 %v2541_v36, %v2231_v43  ;;  %v2351_v36 = vld [vmem:[%s3069_s29 + $0x118] sm:$0xf0] }
 0x1a6   : > { %v3301_v27 = vadd.f32 %v1196_v56, %v1176_v44  ;;  %v3303_v28 = vadd.f32 %v1197_v9, %v1189_v45  ;;  %1748 = vmatpush.bf16.msrb.mxu1 %v2314_v57  ;;  %v2543_v9 = vld [vmem:[%s3069_s29 + $0x34] sm:$0xf]  ;;  %v2434_v57 = vor.u32 %v2591_v59, %v2431_v0 }
 0x1a7   : > { %v2242_v23 = vor.u32 %v2543_v9, %v2239_v21  ;;  %v2423_v9 = vld [vmem:[%s3069_s29 + $0x1a8] sm:$0xf0]  ;;  %v2537_v21 = vld [vmem:[%s3069_s29 + $0x4] sm:$0xf] }
 0x1a8   : > { %v2209_v42 = vmul.f32 -1.442695, %v3301_v27  ;;  %v2210_v56 = vmul.f32 -1.442695, %v3303_v28  ;;  %1761 = vmatpush.bf16.msrb.mxu2 %v2378_v4  ;;  %1775 = vmatpush.bf16.msrb.mxu3 %v2434_v57  ;;  %v2218_v32 = vor.u32 %v2537_v21, %v2215_v22 }
 0x1a9   : > { %v2699_v6 = vpop.eup %2698  ;;  %1736 = vmatpush.bf16.msrb.mxu0 %v2242_v23 }
 0x1aa   : > { %v2701_v12 = vpop.eup %2700  ;;  %v3315_v41 = vadd.f32 1.0, %v2699_v6  ;;  %2702 = vpow2.f32 %v2209_v42  ;;  %1749 = vmatpush.bf16.msrb.mxu1 %v2306_v29  ;;  %v2298_v6 = vor.u32 %v2557_v51, %v2295_v52 }
 0x1ab   : > { %v3319_v16 = vadd.f32 1.0, %v2701_v12  ;;  %2704 = vpow2.f32 %v2210_v56  ;;  %v1177_v17 = vpop.f32.mrf.mxu2  ;;  %v1190_v18 = vpop.f32.mrf.mxu3 }
 0x1ac   : > { %2706 = vrcp.f32 %v3315_v41  ;;  %v1231_v26 = vand.u32 2147483647, %v3315_v41  ;;  %v1233_v38 = vand.u32 2147483648, %v3315_v41  ;;  %vm1227_vm6 = vweird.f32 %v3315_v41  ;;  %v2589_v17 = vld [vmem:[%s3069_s29 + $0x1a4] sm:$0xf]  ;;  %1762 = vmatpush.bf16.msrb.mxu2 %v2370_v1 }
 0x1ad   : > { %2708 = vrcp.f32 %v3319_v16  ;;  %v1246_v45 = vand.u32 2147483647, %v3319_v16  ;;  %v1248_v46 = vand.u32 2147483648, %v3319_v16  ;;  %1737 = vmatpush.bf16.msrb.mxu0 %v2234_v47  ;;  %vm1242_vm10 = vweird.f32 %v3319_v16 }
 0x1ae   : > { %vm3349_vm5 = vcmp.eq.f32.partialorder %v1231_v26, 8.507059e+37  ;;  %v1234_v61 = vor.u32 1.1754944e-38, %v1233_v38  ;;  %1750 = vmatpush.bf16.msrb.mxu1 %v2298_v6  ;;  %v2426_v29 = vor.u32 %v2589_v17, %v2423_v9  ;;  %v2282_v47 = vor.u32 %v2553_v30, %v2279_v31 }
 0x1af   : > { %vm3367_vm8 = vcmp.eq.f32.partialorder %v1246_v45, 8.507059e+37  ;;  %v1249_v56 = vor.u32 1.1754944e-38, %v1248_v46  ;;  %v2587_v45 = vld [vmem:[%s3069_s29 + $0x194] sm:$0xf] }
 0x1b0   : > { %v2703_v35 = vpop.eup %2702  ;;  %1763 = vmatpush.bf16.msrb.mxu2 %v2362_v15  ;;  %1776 = vmatpush.bf16.msrb.mxu3 %v2426_v29 }
 0x1b1   : > { %v2705_v37 = vpop.eup %2704  ;;  %v3336_v39 = vadd.f32 1.0, %v2703_v35  ;;  %1738 = vmatpush.bf16.msrb.mxu0 %v2226_v10 }
 0x1b2   : > { %v3339_v44 = vpop.eup %2706  ;;  %v3343_v7 = vadd.f32 1.0, %v2705_v37  ;;  %1751 = vmatpush.bf16.msrb.mxu1 %v2290_v20 }
 0x1b3   : > { %v3345_v48 = vpop.eup %2708  ;;  %v1223_v49 = vmul.f32 %v3339_v44, %v3315_v41  ;;  %2710 = vrcp.f32 %v3336_v39  ;;  %vm1228_vm7 = vweird.f32 %v3339_v44  ;;  %v1261_v13 = vand.u32 2147483647, %v3336_v39 }
 0x1b4   : > { %v1238_v53 = vmul.f32 %v3345_v48, %v3319_v16  ;;  %2712 = vrcp.f32 %v3343_v7  ;;  %vm1243_vm9 = vweird.f32 %v3345_v48  ;;  %vm3391_vm11 = vmor %vm1227_vm6, %vm1228_vm7  ;;  %v1263_v26 = vand.u32 2147483648, %v3336_v39 }
 0x1b5   : > { %v1224_v60 = vsub.f32 1.0, %v1223_v49  ;;  %vm1244_vm12 = vmor %vm1242_vm10, %vm1243_vm9  ;;  %v1276_v4 = vand.u32 2147483647, %v3343_v7  ;;  %1739 = vmatpush.bf16.msrb.mxu0 %v2218_v32  ;;  %vm1257_vm14 = vweird.f32 %v3336_v39  ;;  %v1278_v52 = vand.u32 2147483648, %v3343_v7 }
 0x1b6   : > { %v1239_v2 = vsub.f32 1.0, %v1238_v53  ;;  %v2569_v53 = vld [vmem:[%s3069_s29 + $0x104] sm:$0xf]  ;;  %v1264_v62 = vor.u32 1.1754944e-38, %v1263_v26  ;;  %vm1272_vm1 = vweird.f32 %v3343_v7  ;;  %1752 = vmatpush.bf16.msrb.mxu1 %v2282_v47  ;;  %vm1262_vm2 = vcmp.eq.f32.partialorder %v1261_v13, 8.507059e+37 }
 0x1b7   : > { %v1225_v33 = vmul.f32 %v3339_v44, %v1224_v60  ;;  %v2585_v60 = vld [vmem:[%s3069_s29 + $0x184] sm:$0xf]  ;;  %v2346_v42 = vor.u32 %v2569_v53, %v2343_v5  ;;  %v1279_v3 = vor.u32 1.1754944e-38, %v1278_v52  ;;  %vm1277_vm4 = vcmp.eq.f32.partialorder %v1276_v4, 8.507059e+37 }
 0x1b8   : > { %v1240_v12 = vmul.f32 %v3345_v48, %v1239_v2 }
 0x1b9   : > { %v3380_v18 = vpop.eup %2710  ;;  %v1226_v19 = vadd.f32 %v3339_v44, %v1225_v33 }
 0x1ba   : > { %v1241_v24 = vadd.f32 %v3345_v48, %v1240_v12  ;;  %v1253_v25 = vmul.f32 %v3380_v18, %v3336_v39  ;;  %v2713_v41 = vpop.eup %2712  ;;  %vm1258_vm13 = vweird.f32 %v3380_v18  ;;  %v1354_v12 = vld [vmem:[%s379_s9] sm:$0x3] }
 0x1bb   : > { %v1230_v35 = vsel %vm3391_vm11, %v3339_v44, %v1226_v19  ;;  %v1268_v43 = vmul.f32 %v2713_v41, %v3343_v7  ;;  %v2415_v44 = vld [vmem:[%s3069_s29 + $0x198] sm:$0xf0]  ;;  %vm1273_vm15 = vweird.f32 %v2713_v41  ;;  %vm1259_vm0 = vmor %vm1257_vm14, %vm1258_vm13  ;;  %v1356_v13 = vperm.slane %v1354_v12, 0 }
 0x1bc   : > { %v1235_v37 = vsel %vm3349_vm5, %v1234_v61, %v1230_v35  ;;  %v1245_v38 = vsel %vm1244_vm12, %v3345_v48, %v1241_v24  ;;  %v1254_v40 = vsub.f32 1.0, %v1253_v25  ;;  %v2418_v54 = vor.u32 %v2587_v45, %v2415_v44  ;;  %v2407_v61 = vld [vmem:[%s3069_s29 + $0x188] sm:$0xf0]  ;;  %vm1274_vm3 = vmor %vm1272_vm1, %vm1273_vm15  ;;  %s1802_s29 = sshll.u32 %s370_s18, 4  ;;  %s1803_s29 = int_to_ptr.vmem [resolvable:$true] %s1802_s29 }
 0x1bd   : > { %v1282_v46 = vmul.f32 %v1235_v37, %v3274_v55  ;;  %v1250_v16 = vsel %vm3367_vm8, %v1249_v56, %v1245_v38  ;;  %v1269_v50 = vsub.f32 1.0, %v1268_v43  ;;  %v2354_v55 = vor.u32 %v2571_v34, %v2351_v36 }
 0x1be   : > { %v1283_v49 = vmul.f32 %v1250_v16, %v3276_v58  ;;  %v1255_v48 = vmul.f32 %v3380_v18, %v1254_v40  ;;  %1777 = vmatpush.bf16.msrb.mxu3 %v2418_v54  ;;  %v2410_v33 = vor.u32 %v2585_v60, %v2407_v61  ;;  %v1357_v22 = vperm.slane %v1354_v12, 1 }
 0x1bf   : > { %v1286_v51 = vpack.c.bf16 %v1282_v46, %v1282_v46  ;;  %v1270_v58 = vmul.f32 %v2713_v41, %v1269_v50  ;;  %1764 = vmatpush.bf16.msrb.mxu2 %v2354_v55 }
 0x1c0   : > { %v1287_v59 = vpack.c.bf16 %v1283_v49, %v1283_v49  ;;  %v1256_v0 = vadd.f32 %v3380_v18, %v1255_v48 }
 0x1c1   : > { %1688 = vmatmul.bf16.vlgmr.msra.gmra.mxu0 %v1286_v51  ;;  %v1271_v2 = vadd.f32 %v2713_v41, %v1270_v58 }
 0x1c2   : > { %v1260_v63 = vsel %vm1259_vm0, %v3380_v18, %v1256_v0  ;;  %1701 = vmatmul.bf16.vlgmr.msra.gmra.mxu1 %v1287_v59  ;;  %1778 = vmatpush.bf16.msrb.mxu3 %v2410_v33 }
 0x1c3   : > { %v1265_v56 = vsel %vm1262_vm2, %v1264_v62, %v1260_v63  ;;  %v1275_v6 = vsel %vm1274_vm3, %v2713_v41, %v1271_v2  ;;  %1765 = vmatpush.bf16.msrb.mxu2 %v2346_v42 }
 0x1c4   : > { %v1284_v7 = vmul.f32 %v1265_v56, %v3301_v27  ;;  %v1280_v1 = vsel %vm1277_vm4, %v1279_v3, %v1275_v6 }
 0x1c5   : > { %v1285_v39 = vmul.f32 %v1280_v1, %v3303_v28 }
 0x1c6   : > { %v1288_v8 = vpack.c.bf16 %v1284_v7, %v1284_v7 }
 0x1c7   : > { %v1289_v11 = vpack.c.bf16 %v1285_v39, %v1285_v39 }
 0x1c8   : > { %1714 = vmatmul.bf16.vlgmr.msra.gmra.mxu2 %v1288_v8 }
 0x1c9   : > { %1727 = vmatmul.bf16.vlgmr.msra.gmra.mxu3 %v1289_v11 }
 0x1d1   : > { %1740 = vmatmul.bf16.vlgmr.msrb.gmra.mxu0 %v1286_v51 }
 0x1d2   : > { %1753 = vmatmul.bf16.vlgmr.msrb.gmra.mxu1 %v1287_v59 }
 0x1d8   : > { %1766 = vmatmul.bf16.vlgmr.msrb.gmra.mxu2 %v1288_v8 }
 0x1d9   : > { %1779 = vmatmul.bf16.vlgmr.msrb.gmra.mxu3 %v1289_v11 }
 0x23e   : > { %v1689_v27 = vpop.f32.mrf.mxu0 }
 0x23f   : > { %v1702_v28 = vpop.f32.mrf.mxu1  ;;  %v1690_v57 = vadd.f32 %v1689_v27, %v1356_v13 }
 0x241   : > { %v1703_v17 = vadd.f32 %v1702_v28, %v1690_v57 }
 0x246   : > { %v1691_v10 = vpop.f32.mrf.mxu0 }
 0x247   : > { %v1704_v14 = vpop.f32.mrf.mxu1 }
 0x24b   : > { %v1715_v18 = vpop.f32.mrf.mxu2 }
 0x24c   : > { %v1716_v19 = vadd.f32 %v1715_v18, %v1703_v17  ;;  %v1728_v20 = vpop.f32.mrf.mxu3 }
 0x24e   : > { %v1729_v15 = vadd.f32 %v1728_v20, %v1716_v19  ;;  %v1741_v9 = vpop.f32.mrf.mxu0 }
 0x24f   : > { %v1754_v21 = vpop.f32.mrf.mxu1  ;;  %v1742_v25 = vadd.f32 %v1741_v9, %v1357_v22 }
 0x250   : > { %1784 = vst [vmem:[%s370_s18] sm:$0xff] %v1729_v15 }
 0x251   : > { %v1755_v30 = vadd.f32 %v1754_v21, %v1742_v25 }
 0x253   : > { %v1717_v23 = vpop.f32.mrf.mxu2 }
 0x254   : > { %v1730_v24 = vpop.f32.mrf.mxu3 }
 0x256   : > { %v1743_v26 = vpop.f32.mrf.mxu0 }
 0x257   : > { %v1756_v29 = vpop.f32.mrf.mxu1 }
 0x25b   : > { %v1767_v31 = vpop.f32.mrf.mxu2 }
 0x25c   : > { %v1768_v41 = vadd.f32 %v1767_v31, %v1755_v30  ;;  %v1780_v35 = vpop.f32.mrf.mxu3 }
 0x25e   : > { %v1781_v4 = vadd.f32 %v1780_v35, %v1768_v41 }
 0x260   : > { %1785 = vst [vmem:[%s370_s18 + $0x8] sm:$0xff] %v1781_v4 }
 0x261   : > { %2831 = shalt.err (!%p2828_p2)
}
 0x262   : > { %2612 = dma.vmem_to_hbm [thread:$0]  (%p3000_p8), %s1803_s29, 256, %s1805_s11, %s1787_s12  }
 0x263   : > { %v1769_v32 = vpop.f32.mrf.mxu2 }
 0x264   : > { %v1782_v34 = vpop.f32.mrf.mxu3 }
 0x265 PF: > { %s3524_s3 = sld [smem:[#allocation13_spill]]  ;;  %p2626_p5 = pnand %p1935_p1, %p3005_p10 }
 0x266   : > { %s3526_s9 = sld [smem:[#allocation14_spill]] }
 0x267   : > { %p2627_p7 = pneg %p2626_p5 }
 0x26b   : > { %s1816_s15 = sand.u32 1, %s3524_s3  }
 0x26c   : > { %s1817_s18 = scalar_lea.sflag [#allocation4], %s1816_s15 }
 0x26d   : > { %2869 = dma.done.wait (%p2627_p7), %s1817_s18, 256  }
 0x26e   : > { %2871 = vsyncadd (%p2627_p7), %s1817_s18, 4294967040  ;;  %s22_s29 = sadd.s32 1, %s3526_s9   ;;  %s3527_s24 = smov %s2878_s25 }
 0x26f   : > { %p19_p4 = scmp.ge.s32.totalorder %s22_s29, 4   ;;  %s3528_s25 = smov %s2882_s26 }
 0x270   : > { %s3529_s26 = smov %s3049_s14  ;;  %s3530_s27 = smov %s2890_s28 }
 0x271   : > { %s3531_s28 = smov %s3533_s19  ;;  %21 = sbr.rel (!%p19_p4) target bundleno = 10 (0xa), region = 106 }
 0x276   :  { %1823 = vsyncpa [#allocation3], 1 }
 0x277   :  { %1825 = vsyncpa [#allocation3 + $0x1], 1 }
 0x278   :  { %1826 = vsyncpa [#allocation6], 1 }
 0x279   :  { %1827 = vsyncpa [#allocation4], 1 }
 0x27a   :  { %1829 = vsyncpa [#allocation4 + $0x1], 1 }

</bundles_post_ra>
